<compile_context>
chip_gen: v7x
topology: tpu7x:2x2x1
jax: 0.10.0
libtpu: 0.0.40
codegen_flags: <defaults>
</compile_context>

<pallas_src>
import functools

import jax
import jax.numpy as jnp
import numpy as np
from jax import lax
from jax.experimental import pallas as pl
from jax.experimental.pallas import tpu as pltpu


def _sigmoid(x):
    # EUP-friendly sigmoid: one tanh instead of exp + reciprocal.
    return 0.5 * (jnp.tanh(0.5 * x) + 1.0)


def _bilstm_kernel(emb_f_ref, emb_b_ref, wih_ref, whh_ref, bias_ref,
                   out_f_ref, out_b_ref, h_n_ref, c_n_ref,
                   xg_f_sc, xg_b_sc, h_sc, c_sc,
                   *, seq_len, unroll, masked):
    """Fused bidirectional LSTM: both directions interleaved per time chunk.

    grid = (num_chunks,)   -- sequential ("arbitrary") recurrence axis.

    emb_f_ref : (1, Tc*B, E)  bf16  embedded rows for the forward dir's chunk c
    emb_b_ref : (1, Tc*B, E)  bf16  embedded rows for the backward dir's chunk nc-1-c
    wih_ref   : (2, E, 4H)    bf16  input weights (transposed), resident
    whh_ref   : (2, H, 4H)    bf16  recurrent weights (transposed), resident
    bias_ref  : (2, 4H)       f32   combined b_ih + b_hh
    out_f_ref : (1, Tc*B, H)  f32   forward hidden outputs for chunk c
    out_b_ref : (1, Tc*B, H)  f32   backward hidden outputs for chunk nc-1-c
    h_n_ref, c_n_ref : (2, B, H)    final states (resident; last chunk's write wins)
    xg_*_sc   : (Tc*B, 4H)    f32   per-chunk x-gate scratch (fused input projection)
    h_sc, c_sc: (2, B, H)     f32   per-direction carries, persist across chunks
    """
    c_idx = pl.program_id(0)
    nc = pl.num_programs(0)

    B, H = h_sc.shape[1], h_sc.shape[2]
    TB = emb_f_ref.shape[1]
    Tc = TB // B
    G = 4 * H

    @pl.when(c_idx == 0)
    def _():
        h_sc[...] = jnp.zeros_like(h_sc)
        c_sc[...] = jnp.zeros_like(c_sc)

    # ---- Fused input projection (no x-gate round trip through HBM): one large
    # parallel (Tc*B, E) @ (E, 4H) MXU matmul per direction per chunk; bf16
    # operands, f32 accumulation.
    xg_f_sc[...] = (jnp.dot(emb_f_ref[0], wih_ref[0],
                            preferred_element_type=jnp.float32) + bias_ref[0])
    xg_b_sc[...] = (jnp.dot(emb_b_ref[0], wih_ref[1],
                            preferred_element_type=jnp.float32) + bias_ref[1])

    whh_f = whh_ref[0]          # (H, 4H) bf16 -- loaded once per chunk
    whh_b = whh_ref[1]
    base_f = c_idx * Tc                   # global (padded) time of fwd chunk start
    base_b = (nc - 1 - c_idx) * Tc        # global (padded) time of bwd chunk start

    def lstm_cell(x_g, h, c, whh):
        # TODO(synk): gate slices are lane-aligned only when H % 128 == 0; keep the
        #             per-direction hidden a multiple of 128 at realistic sizes.
        g = x_g + jnp.dot(h.astype(whh.dtype), whh,
                          preferred_element_type=jnp.float32)
        i_g = _sigmoid(g[:, 0 * H:1 * H])
        f_g = _sigmoid(g[:, 1 * H:2 * H])
        g_g = jnp.tanh(g[:, 2 * H:3 * H])
        o_g = _sigmoid(g[:, 3 * H:4 * H])
        c_new = f_g * c + i_g * g_g
        h_new = o_g * jnp.tanh(c_new)
        return h_new, c_new

    def step(i, carry):
        h_f, c_f, h_b, c_b = carry
        row_b = Tc - 1 - i                       # backward walks its chunk in reverse
        idx_f = pl.multiple_of(i * B, B)
        idx_b = pl.multiple_of(row_b * B, B)
        # Two independent dependency chains (fwd + bwd) interleaved in one step:
        # hides MXU/EUP latency of the tiny recurrent dots on 1-TC chips.
        x_f = xg_f_sc[pl.ds(idx_f, B)]           # (B, 4H)
        x_b = xg_b_sc[pl.ds(idx_b, B)]           # (B, 4H)
        hf_new, cf_new = lstm_cell(x_f, h_f, c_f, whh_f)
        hb_new, cb_new = lstm_cell(x_b, h_b, c_b, whh_b)
        if masked:
            # Tail padding: freeze the carries for padded time rows (>= seq_len).
            m_f = ((base_f + i) < seq_len).astype(jnp.float32)
            m_b = ((base_b + row_b) < seq_len).astype(jnp.float32)
            hf_new = m_f * hf_new + (1.0 - m_f) * h_f
            cf_new = m_f * cf_new + (1.0 - m_f) * c_f
            hb_new = m_b * hb_new + (1.0 - m_b) * h_b
            cb_new = m_b * cb_new + (1.0 - m_b) * c_b
        out_f_ref[0, pl.ds(idx_f, B)] = hf_new.astype(out_f_ref.dtype)
        out_b_ref[0, pl.ds(idx_b, B)] = hb_new.astype(out_b_ref.dtype)
        return hf_new, cf_new, hb_new, cb_new

    init = (h_sc[0], c_sc[0], h_sc[1], c_sc[1])
    # Partial unroll on big chunks keeps LLO scheduling visibility without blowing
    # the 64-entry vreg file (full unroll spills on the serial critical path).
    h_f, c_f, h_b, c_b = lax.fori_loop(0, Tc, step, init, unroll=unroll)

    h_sc[0] = h_f
    c_sc[0] = c_f
    h_sc[1] = h_b
    c_sc[1] = c_b
    # Resident output blocks (constant index map): the final chunk's write is what
    # lands in HBM. Forward final = state after t=T-1, backward final = after t=0.
    h_n_ref[0] = h_f.astype(h_n_ref.dtype)
    h_n_ref[1] = h_b.astype(h_n_ref.dtype)
    c_n_ref[0] = c_f.astype(c_n_ref.dtype)
    c_n_ref[1] = c_b.astype(c_n_ref.dtype)


def _vmem_budget_bytes(tc, B, E, H):
    """Rough per-grid-step VMEM working set (double-buffered streams + residents)."""
    G = 4 * H
    bf16, f32 = 2, 4
    emb_streams = 2 * 2 * tc * B * E * bf16          # fwd + bwd, double-buffered
    out_streams = 2 * 2 * tc * B * H * f32
    weights = 2 * (2 * E * G + 2 * H * G) * bf16 + 2 * 2 * G * f32
    xg_scratch = 2 * tc * B * G * f32
    carries = 2 * 2 * B * H * f32
    return emb_streams + out_streams + weights + xg_scratch + carries


_VMEM_TILE_CAP = 24 * 1024 * 1024   # keep tiles comfortably inside v7x's 64 MiB/TC


def _pick_time_chunk(T, B, E, H, target):
    tc = max(1, min(T, target))
    while tc > 1 and _vmem_budget_bytes(tc, B, E, H) > _VMEM_TILE_CAP:
        tc -= 1
    return tc


def bidirectional_lstm(embedded, wih_t, whh_t, bias, *, time_chunk=32):
    """embedded: (T,B,E) f32; wih_t: (2,E,4H); whh_t: (2,H,4H); bias: (2,4H).

    Returns (out_fwd (T,B,H), out_bwd (T,B,H), h_n (2,B,H), c_n (2,B,H)), outputs
    already in original time order; index 0 = forward, 1 = backward.
    """
    T, B, E = embedded.shape
    H = whh_t.shape[1]
    G = 4 * H

    Tc = _pick_time_chunk(T, B, E, H, time_chunk)
    nc = -(-T // Tc)
    Tp = nc * Tc
    masked = Tp != T

    # bf16 MXU operands (f32 accumulation and gate math stay f32 inside the kernel).
    emb = embedded.astype(jnp.bfloat16)
    if masked:
        emb = jnp.pad(emb, ((0, Tp - T), (0, 0), (0, 0)))
    # Pre-flatten each time chunk to (Tc*B, E): the in-kernel projection matmul
    # then needs no reshape and the block trailing dims equal the full dims.
    emb = emb.reshape(nc, Tc * B, E)
    wih_bf = wih_t.astype(jnp.bfloat16)
    whh_bf = whh_t.astype(jnp.bfloat16)
    bias_f32 = bias.astype(jnp.float32)

    if Tc <= 8:
        unroll = True                                    # tiny chunk: full unroll
    else:
        unroll = max(u for u in (4, 2, 1) if Tc % u == 0)  # partial, avoid spills

    vmem_limit = int(min(56 * 1024 * 1024,
                         max(32 * 1024 * 1024,
                             2 * _vmem_budget_bytes(Tc, B, E, H))))

    kernel = functools.partial(_bilstm_kernel, seq_len=T, unroll=unroll,
                               masked=masked)

    out_f, out_b, h_n, c_n = pl.pallas_call(
        kernel,
        out_shape=(jax.ShapeDtypeStruct((nc, Tc * B, H), jnp.float32),
                   jax.ShapeDtypeStruct((nc, Tc * B, H), jnp.float32),
                   jax.ShapeDtypeStruct((2, B, H), jnp.float32),
                   jax.ShapeDtypeStruct((2, B, H), jnp.float32)),
        grid_spec=pltpu.PrefetchScalarGridSpec(
            num_scalar_prefetch=0,
            grid=(nc,),
            in_specs=[
                pl.BlockSpec((1, Tc * B, E), lambda c: (c, 0, 0)),           # fwd chunk
                pl.BlockSpec((1, Tc * B, E), lambda c: (nc - 1 - c, 0, 0)),  # bwd chunk
                pl.BlockSpec((2, E, G), lambda c: (0, 0, 0)),                # W_ih^T
                pl.BlockSpec((2, H, G), lambda c: (0, 0, 0)),                # W_hh^T
                pl.BlockSpec((2, G), lambda c: (0, 0)),                      # bias
            ],
            out_specs=(
                pl.BlockSpec((1, Tc * B, H), lambda c: (c, 0, 0)),           # fwd out
                pl.BlockSpec((1, Tc * B, H), lambda c: (nc - 1 - c, 0, 0)),  # bwd out
                pl.BlockSpec((2, B, H), lambda c: (0, 0, 0)),                # h_n
                pl.BlockSpec((2, B, H), lambda c: (0, 0, 0)),                # c_n
            ),
            scratch_shapes=[pltpu.VMEM((Tc * B, G), jnp.float32),   # fwd x-gates
                            pltpu.VMEM((Tc * B, G), jnp.float32),   # bwd x-gates
                            pltpu.VMEM((2, B, H), jnp.float32),     # h carries
                            pltpu.VMEM((2, B, H), jnp.float32)],    # c carries
        ),
        compiler_params=pltpu.CompilerParams(
            dimension_semantics=("arbitrary",),
            vmem_limit_bytes=vmem_limit),
    )(emb, emb, wih_bf, whh_bf, bias_f32)

    out_f = out_f.reshape(Tp, B, H)[:T]
    out_b = out_b.reshape(Tp, B, H)[:T]
    return out_f, out_b, h_n, c_n


class EncoderRNNPallas:
    """JAX/Pallas equivalent of the PyTorch EncoderRNN module (n_layers=1)."""

    def __init__(self, input_vocab_size, embed_size, hidden_size,
                 num_direction=2, dropout=0.2, n_layers=1, key=None):
        assert n_layers == 1, "only n_layers=1 implemented (matches reference usage)"
        self.input_vocab_size = input_vocab_size
        self.embed_size = embed_size
        self.hidden_size = hidden_size // num_direction   # per-direction hidden
        H, E = self.hidden_size, embed_size

        key = jax.random.PRNGKey(0) if key is None else key
        k_emb, k0, k1, k2, k3, k4, k5, k6, k7 = jax.random.split(key, 9)

        # nn.Embedding default init: N(0, 1)
        self.embedding = jax.random.normal(k_emb, (input_vocab_size, E), jnp.float32)

        # nn.LSTM default init: U(-1/sqrt(H), 1/sqrt(H)); gate order i, f, g, o
        bound = 1.0 / (H ** 0.5)
        u = lambda k, s: jax.random.uniform(k, s, jnp.float32, -bound, bound)

        wih_f, whh_f = u(k0, (4 * H, E)), u(k1, (4 * H, H))
        b_f = u(k2, (4 * H,)) + u(k3, (4 * H,))               # b_ih + b_hh
        wih_b, whh_b = u(k4, (4 * H, E)), u(k5, (4 * H, H))
        b_b = u(k6, (4 * H,)) + u(k7, (4 * H,))

        # direction-stacked, transposed layouts consumed by the kernel
        self.wih_t = jnp.stack([wih_f.T, wih_b.T], axis=0)    # (2, E, 4H)
        self.whh_t = jnp.stack([whh_f.T, whh_b.T], axis=0)    # (2, H, 4H)
        self.bias = jnp.stack([b_f, b_b], axis=0)             # (2, 4H)

        # TODO(synk): inter-layer dropout is a no-op for n_layers=1 (matches PyTorch).

    def __call__(self, input_seqs_batch, *, time_chunk=32):
        # input_seqs_batch: (T, B) int32 token ids
        embedded = jnp.take(self.embedding, input_seqs_batch, axis=0)   # (T, B, E)
        out_f, out_b, h_n, c_n = bidirectional_lstm(
            embedded, self.wih_t, self.whh_t, self.bias, time_chunk=time_chunk)
        # PyTorch bidirectional layout: [fwd, bwd] concat on the feature axis.
        e_outputs = jnp.concatenate([out_f, out_b], axis=-1)            # (T, B, 2H)
        return e_outputs, (h_n, c_n)


def _reference_forward(enc, tokens):
    """Pure-JAX (lax.scan) bidirectional LSTM reference with the same
    bf16-operand / f32-accumulate matmul precision as the kernel."""
    embedded = jnp.take(enc.embedding, tokens, axis=0)
    emb_bf = embedded.astype(jnp.bfloat16)
    wih = enc.wih_t.astype(jnp.bfloat16)
    whh = enc.whh_t.astype(jnp.bfloat16)
    T, B, _ = embedded.shape
    H = enc.hidden_size

    def run(d):
        xs = emb_bf if d == 0 else emb_bf[::-1]

        def step(carry, x):
            h, c = carry
            g = (jnp.dot(x, wih[d], preferred_element_type=jnp.float32)
                 + jnp.dot(h.astype(jnp.bfloat16), whh[d],
                           preferred_element_type=jnp.float32)
                 + enc.bias[d])
            i_g = _sigmoid(g[:, :H])
            f_g = _sigmoid(g[:, H:2 * H])
            g_g = jnp.tanh(g[:, 2 * H:3 * H])
            o_g = _sigmoid(g[:, 3 * H:])
            c_new = f_g * c + i_g * g_g
            h_new = o_g * jnp.tanh(c_new)
            return (h_new, c_new), h_new

        init = (jnp.zeros((B, H), jnp.float32), jnp.zeros((B, H), jnp.float32))
        (h_f, c_f), outs = lax.scan(step, init, xs)
        if d == 1:
            outs = outs[::-1]
        return outs, h_f, c_f

    of, hf, cf = run(0)
    ob, hb, cb = run(1)
    return (jnp.concatenate([of, ob], axis=-1),
            (jnp.stack([hf, hb]), jnp.stack([cf, cb])))


if __name__ == "__main__":
    VOCAB, EMBED, HIDDEN = 50, 16, 32     # per-direction hidden = 16
    T, B = 8, 2

    key = jax.random.PRNGKey(0)
    k_tok, k_param = jax.random.split(key)
    tokens = jax.random.randint(k_tok, (T, B), 0, VOCAB, dtype=jnp.int32)

    enc = EncoderRNNPallas(VOCAB, EMBED, HIDDEN, key=k_param)
    ref_out, (ref_h, ref_c) = _reference_forward(enc, tokens)
    tol = dict(atol=2e-3, rtol=2e-2)

    # Config 1: single chunk (T divides the chunk), no tail padding.
    e_outputs, (e_h, e_c) = enc(tokens)
    jax.block_until_ready((e_outputs, e_h, e_c))
    assert e_outputs.shape == (T, B, HIDDEN)
    assert e_h.shape == (2, B, HIDDEN // 2)
    assert e_c.shape == (2, B, HIDDEN // 2)
    np.testing.assert_allclose(np.asarray(e_outputs), np.asarray(ref_out), **tol)
    np.testing.assert_allclose(np.asarray(e_h), np.asarray(ref_h), **tol)
    np.testing.assert_allclose(np.asarray(e_c), np.asarray(ref_c), **tol)

    # Config 2: force the multi-chunk + tail-padding/masking path (Tc=3 -> Tp=9).
    e_outputs2, (e_h2, e_c2) = enc(tokens, time_chunk=3)
    jax.block_until_ready((e_outputs2, e_h2, e_c2))
    np.testing.assert_allclose(np.asarray(e_outputs2), np.asarray(ref_out), **tol)
    np.testing.assert_allclose(np.asarray(e_h2), np.asarray(ref_h), **tol)
    np.testing.assert_allclose(np.asarray(e_c2), np.asarray(ref_c), **tol)

    print("KERNEL_OK")
</pallas_src>

<mosaic_0001>
module attributes {stable_mosaic.version = 11 : i64} {
  func.func @_bilstm_kernel(%arg0: i32, %arg1: memref<1x16x16xbf16, #tpu.memory_space<vmem>>, %arg2: memref<1x16x16xbf16, #tpu.memory_space<vmem>>, %arg3: memref<2x16x64xbf16, #tpu.memory_space<vmem>>, %arg4: memref<2x16x64xbf16, #tpu.memory_space<vmem>>, %arg5: memref<2x64xf32, #tpu.memory_space<vmem>>, %arg6: memref<1x16x16xf32, #tpu.memory_space<vmem>>, %arg7: memref<1x16x16xf32, #tpu.memory_space<vmem>>, %arg8: memref<2x2x16xf32, #tpu.memory_space<vmem>>, %arg9: memref<2x2x16xf32, #tpu.memory_space<vmem>>, %arg10: memref<16x64xf32, #tpu.memory_space<vmem>>, %arg11: memref<16x64xf32, #tpu.memory_space<vmem>>, %arg12: memref<2x2x16xf32, #tpu.memory_space<vmem>>, %arg13: memref<2x2x16xf32, #tpu.memory_space<vmem>>) attributes {dimension_semantics = [#tpu.dimension_semantics<arbitrary>], iteration_bounds = array<i64: 1>, scalar_prefetch = 0 : i64, scratch_operands = 4 : i64, tpu.core_type = #tpu.core_type<tc>, window_params = [{transform_indices = @transform_0, window_bounds = array<i64: 1, 16, 16>}, {transform_indices = @transform_1, window_bounds = array<i64: 1, 16, 16>}, {pipeline_mode = #tpu.pipeline_mode<synchronous>, transform_indices = @transform_2, window_bounds = array<i64: 2, 16, 64>}, {pipeline_mode = #tpu.pipeline_mode<synchronous>, transform_indices = @transform_3, window_bounds = array<i64: 2, 16, 64>}, {pipeline_mode = #tpu.pipeline_mode<synchronous>, transform_indices = @transform_4, window_bounds = array<i64: 2, 64>}, {transform_indices = @transform_5, window_bounds = array<i64: 1, 16, 16>}, {transform_indices = @transform_6, window_bounds = array<i64: 1, 16, 16>}, {pipeline_mode = #tpu.pipeline_mode<synchronous>, transform_indices = @transform_7, window_bounds = array<i64: 2, 2, 16>}, {pipeline_mode = #tpu.pipeline_mode<synchronous>, transform_indices = @transform_8, window_bounds = array<i64: 2, 2, 16>}]} {
    %c0_i32 = arith.constant 0 : i32
    %0 = arith.cmpi eq, %arg0, %c0_i32 : i32
    %1 = arith.extui %0 : i1 to i32
    %c0_i32_0 = arith.constant 0 : i32
    %2 = arith.cmpi ne, %1, %c0_i32_0 : i32
    scf.if %2 {
      %cst_295 = arith.constant 0.000000e+00 : f32
      %741 = vector.broadcast %cst_295 : f32 to vector<2x2x16xf32>
      %c0_296 = arith.constant 0 : index
      %c0_297 = arith.constant 0 : index
      %c0_298 = arith.constant 0 : index
      %742 = vector.load %arg12[%c0_296, %c0_297, %c0_298] : memref<2x2x16xf32, #tpu.memory_space<vmem>>, vector<2x2x16xf32>
      tpu.vector_store %arg12[%c0_296, %c0_297, %c0_298], %741 {strides = array<i32>} : memref<2x2x16xf32, #tpu.memory_space<vmem>>, vector<2x2x16xf32>,
      %cst_299 = arith.constant 0.000000e+00 : f32
      %743 = vector.broadcast %cst_299 : f32 to vector<2x2x16xf32>
      %c0_300 = arith.constant 0 : index
      %c0_301 = arith.constant 0 : index
      %c0_302 = arith.constant 0 : index
      %744 = vector.load %arg13[%c0_300, %c0_301, %c0_302] : memref<2x2x16xf32, #tpu.memory_space<vmem>>, vector<2x2x16xf32>
      tpu.vector_store %arg13[%c0_300, %c0_301, %c0_302], %743 {strides = array<i32>} : memref<2x2x16xf32, #tpu.memory_space<vmem>>, vector<2x2x16xf32>,
    } else {
    }
    %c0 = arith.constant 0 : index
    %c0_1 = arith.constant 0 : index
    %c0_2 = arith.constant 0 : index
    %3 = vector.load %arg1[%c0, %c0_1, %c0_2] : memref<1x16x16xbf16, #tpu.memory_space<vmem>>, vector<1x16x16xbf16>
    %4 = vector.shape_cast %3 : vector<1x16x16xbf16> to vector<16x16xbf16>
    %c0_3 = arith.constant 0 : index
    %c0_4 = arith.constant 0 : index
    %c0_5 = arith.constant 0 : index
    %5 = vector.load %arg3[%c0_3, %c0_4, %c0_5] : memref<2x16x64xbf16, #tpu.memory_space<vmem>>, vector<1x16x64xbf16>
    %6 = vector.shape_cast %5 : vector<1x16x64xbf16> to vector<16x64xbf16>
    %cst = arith.constant dense<0.000000e+00> : vector<16x64xf32>
    %7 = tpu.matmul %4, %6, %cst {dimension_numbers = #tpu.dot_dimension_numbers<[1], [0], [0], [1], [0, 0, 1, 1], [], []>} : vector<16x16xbf16>, vector<16x64xbf16>, vector<16x64xf32> -> vector<16x64xf32>
    %c0_6 = arith.constant 0 : index
    %c0_7 = arith.constant 0 : index
    %8 = vector.load %arg5[%c0_6, %c0_7] : memref<2x64xf32, #tpu.memory_space<vmem>>, vector<1x64xf32>
    %9 = vector.shape_cast %8 : vector<1x64xf32> to vector<64xf32>
    %10 = vector.shape_cast %9 : vector<64xf32> to vector<1x64xf32>
    %11 = vector.broadcast %10 : vector<1x64xf32> to vector<16x64xf32>
    %12 = arith.addf %7, %11 : vector<16x64xf32>
    %c0_8 = arith.constant 0 : index
    %c0_9 = arith.constant 0 : index
    %13 = vector.load %arg10[%c0_8, %c0_9] : memref<16x64xf32, #tpu.memory_space<vmem>>, vector<16x64xf32>
    tpu.vector_store %arg10[%c0_8, %c0_9], %12 {strides = array<i32>} : memref<16x64xf32, #tpu.memory_space<vmem>>, vector<16x64xf32>,
    %c0_10 = arith.constant 0 : index
    %c0_11 = arith.constant 0 : index
    %c0_12 = arith.constant 0 : index
    %14 = vector.load %arg2[%c0_10, %c0_11, %c0_12] : memref<1x16x16xbf16, #tpu.memory_space<vmem>>, vector<1x16x16xbf16>
    %15 = vector.shape_cast %14 : vector<1x16x16xbf16> to vector<16x16xbf16>
    %c1 = arith.constant 1 : index
    %c0_13 = arith.constant 0 : index
    %c0_14 = arith.constant 0 : index
    %16 = vector.load %arg3[%c1, %c0_13, %c0_14] : memref<2x16x64xbf16, #tpu.memory_space<vmem>>, vector<1x16x64xbf16>
    %17 = vector.shape_cast %16 : vector<1x16x64xbf16> to vector<16x64xbf16>
    %cst_15 = arith.constant dense<0.000000e+00> : vector<16x64xf32>
    %18 = tpu.matmul %15, %17, %cst_15 {dimension_numbers = #tpu.dot_dimension_numbers<[1], [0], [0], [1], [0, 0, 1, 1], [], []>} : vector<16x16xbf16>, vector<16x64xbf16>, vector<16x64xf32> -> vector<16x64xf32>
    %c1_16 = arith.constant 1 : index
    %c0_17 = arith.constant 0 : index
    %19 = vector.load %arg5[%c1_16, %c0_17] : memref<2x64xf32, #tpu.memory_space<vmem>>, vector<1x64xf32>
    %20 = vector.shape_cast %19 : vector<1x64xf32> to vector<64xf32>
    %21 = vector.shape_cast %20 : vector<64xf32> to vector<1x64xf32>
    %22 = vector.broadcast %21 : vector<1x64xf32> to vector<16x64xf32>
    %23 = arith.addf %18, %22 : vector<16x64xf32>
    %c0_18 = arith.constant 0 : index
    %c0_19 = arith.constant 0 : index
    %24 = vector.load %arg11[%c0_18, %c0_19] : memref<16x64xf32, #tpu.memory_space<vmem>>, vector<16x64xf32>
    tpu.vector_store %arg11[%c0_18, %c0_19], %23 {strides = array<i32>} : memref<16x64xf32, #tpu.memory_space<vmem>>, vector<16x64xf32>,
    %c0_20 = arith.constant 0 : index
    %c0_21 = arith.constant 0 : index
    %c0_22 = arith.constant 0 : index
    %25 = vector.load %arg4[%c0_20, %c0_21, %c0_22] : memref<2x16x64xbf16, #tpu.memory_space<vmem>>, vector<1x16x64xbf16>
    %26 = vector.shape_cast %25 : vector<1x16x64xbf16> to vector<16x64xbf16>
    %c1_23 = arith.constant 1 : index
    %c0_24 = arith.constant 0 : index
    %c0_25 = arith.constant 0 : index
    %27 = vector.load %arg4[%c1_23, %c0_24, %c0_25] : memref<2x16x64xbf16, #tpu.memory_space<vmem>>, vector<1x16x64xbf16>
    %28 = vector.shape_cast %27 : vector<1x16x64xbf16> to vector<16x64xbf16>
    %c0_26 = arith.constant 0 : index
    %c0_27 = arith.constant 0 : index
    %c0_28 = arith.constant 0 : index
    %29 = vector.load %arg12[%c0_26, %c0_27, %c0_28] : memref<2x2x16xf32, #tpu.memory_space<vmem>>, vector<1x2x16xf32>
    %30 = vector.shape_cast %29 : vector<1x2x16xf32> to vector<2x16xf32>
    %c0_29 = arith.constant 0 : index
    %c0_30 = arith.constant 0 : index
    %c0_31 = arith.constant 0 : index
    %31 = vector.load %arg13[%c0_29, %c0_30, %c0_31] : memref<2x2x16xf32, #tpu.memory_space<vmem>>, vector<1x2x16xf32>
    %32 = vector.shape_cast %31 : vector<1x2x16xf32> to vector<2x16xf32>
    %c1_32 = arith.constant 1 : index
    %c0_33 = arith.constant 0 : index
    %c0_34 = arith.constant 0 : index
    %33 = vector.load %arg12[%c1_32, %c0_33, %c0_34] : memref<2x2x16xf32, #tpu.memory_space<vmem>>, vector<1x2x16xf32>
    %34 = vector.shape_cast %33 : vector<1x2x16xf32> to vector<2x16xf32>
    %c1_35 = arith.constant 1 : index
    %c0_36 = arith.constant 0 : index
    %c0_37 = arith.constant 0 : index
    %35 = vector.load %arg13[%c1_35, %c0_36, %c0_37] : memref<2x2x16xf32, #tpu.memory_space<vmem>>, vector<1x2x16xf32>
    %36 = vector.shape_cast %35 : vector<1x2x16xf32> to vector<2x16xf32>
    %c0_i32_38 = arith.constant 0 : i32
    %c7_i32 = arith.constant 7 : i32
    %37 = arith.subi %c7_i32, %c0_i32_38 : i32
    %c2_i32 = arith.constant 2 : i32
    %38 = arith.muli %c0_i32_38, %c2_i32 : i32
    %39 = tpu.assume_multiple %38, 2 : i32
    %c2_i32_39 = arith.constant 2 : i32
    %40 = arith.muli %37, %c2_i32_39 : i32
    %41 = tpu.assume_multiple %40, 2 : i32
    %42 = arith.index_cast %39 : i32 to index
    %c0_40 = arith.constant 0 : index
    %43 = vector.load %arg10[%42, %c0_40] : memref<16x64xf32, #tpu.memory_space<vmem>>, vector<2x64xf32>
    %44 = arith.index_cast %41 : i32 to index
    %c0_41 = arith.constant 0 : index
    %45 = vector.load %arg11[%44, %c0_41] : memref<16x64xf32, #tpu.memory_space<vmem>>, vector<2x64xf32>
    %46 = arith.truncf %30 : vector<2x16xf32> to vector<2x16xbf16>
    %cst_42 = arith.constant dense<0.000000e+00> : vector<2x64xf32>
    %47 = tpu.matmul %46, %26, %cst_42 {dimension_numbers = #tpu.dot_dimension_numbers<[1], [0], [0], [1], [0, 0, 1, 1], [], []>} : vector<2x16xbf16>, vector<16x64xbf16>, vector<2x64xf32> -> vector<2x64xf32>
    %48 = arith.addf %43, %47 : vector<2x64xf32>
    %49 = vector.extract_strided_slice %48 {offsets = [0, 0], sizes = [2, 16], strides = [1, 1]} : vector<2x64xf32> to vector<2x16xf32>
    %cst_43 = arith.constant 5.000000e-01 : f32
    %50 = vector.broadcast %cst_43 : f32 to vector<2x16xf32>
    %51 = arith.mulf %50, %49 : vector<2x16xf32>
    %52 = math.tanh %51 : vector<2x16xf32>
    %cst_44 = arith.constant 1.000000e+00 : f32
    %53 = vector.broadcast %cst_44 : f32 to vector<2x16xf32>
    %54 = arith.addf %52, %53 : vector<2x16xf32>
    %cst_45 = arith.constant 5.000000e-01 : f32
    %55 = vector.broadcast %cst_45 : f32 to vector<2x16xf32>
    %56 = arith.mulf %55, %54 : vector<2x16xf32>
    %57 = vector.extract_strided_slice %48 {offsets = [0, 16], sizes = [2, 16], strides = [1, 1]} : vector<2x64xf32> to vector<2x16xf32>
    %cst_46 = arith.constant 5.000000e-01 : f32
    %58 = vector.broadcast %cst_46 : f32 to vector<2x16xf32>
    %59 = arith.mulf %58, %57 : vector<2x16xf32>
    %60 = math.tanh %59 : vector<2x16xf32>
    %cst_47 = arith.constant 1.000000e+00 : f32
    %61 = vector.broadcast %cst_47 : f32 to vector<2x16xf32>
    %62 = arith.addf %60, %61 : vector<2x16xf32>
    %cst_48 = arith.constant 5.000000e-01 : f32
    %63 = vector.broadcast %cst_48 : f32 to vector<2x16xf32>
    %64 = arith.mulf %63, %62 : vector<2x16xf32>
    %65 = vector.extract_strided_slice %48 {offsets = [0, 32], sizes = [2, 16], strides = [1, 1]} : vector<2x64xf32> to vector<2x16xf32>
    %66 = math.tanh %65 : vector<2x16xf32>
    %67 = vector.extract_strided_slice %48 {offsets = [0, 48], sizes = [2, 16], strides = [1, 1]} : vector<2x64xf32> to vector<2x16xf32>
    %cst_49 = arith.constant 5.000000e-01 : f32
    %68 = vector.broadcast %cst_49 : f32 to vector<2x16xf32>
    %69 = arith.mulf %68, %67 : vector<2x16xf32>
    %70 = math.tanh %69 : vector<2x16xf32>
    %cst_50 = arith.constant 1.000000e+00 : f32
    %71 = vector.broadcast %cst_50 : f32 to vector<2x16xf32>
    %72 = arith.addf %70, %71 : vector<2x16xf32>
    %cst_51 = arith.constant 5.000000e-01 : f32
    %73 = vector.broadcast %cst_51 : f32 to vector<2x16xf32>
    %74 = arith.mulf %73, %72 : vector<2x16xf32>
    %75 = arith.mulf %64, %32 : vector<2x16xf32>
    %76 = arith.mulf %56, %66 : vector<2x16xf32>
    %77 = arith.addf %75, %76 : vector<2x16xf32>
    %78 = math.tanh %77 : vector<2x16xf32>
    %79 = arith.mulf %74, %78 : vector<2x16xf32>
    %80 = arith.truncf %34 : vector<2x16xf32> to vector<2x16xbf16>
    %cst_52 = arith.constant dense<0.000000e+00> : vector<2x64xf32>
    %81 = tpu.matmul %80, %28, %cst_52 {dimension_numbers = #tpu.dot_dimension_numbers<[1], [0], [0], [1], [0, 0, 1, 1], [], []>} : vector<2x16xbf16>, vector<16x64xbf16>, vector<2x64xf32> -> vector<2x64xf32>
    %82 = arith.addf %45, %81 : vector<2x64xf32>
    %83 = vector.extract_strided_slice %82 {offsets = [0, 0], sizes = [2, 16], strides = [1, 1]} : vector<2x64xf32> to vector<2x16xf32>
    %cst_53 = arith.constant 5.000000e-01 : f32
    %84 = vector.broadcast %cst_53 : f32 to vector<2x16xf32>
    %85 = arith.mulf %84, %83 : vector<2x16xf32>
    %86 = math.tanh %85 : vector<2x16xf32>
    %cst_54 = arith.constant 1.000000e+00 : f32
    %87 = vector.broadcast %cst_54 : f32 to vector<2x16xf32>
    %88 = arith.addf %86, %87 : vector<2x16xf32>
    %cst_55 = arith.constant 5.000000e-01 : f32
    %89 = vector.broadcast %cst_55 : f32 to vector<2x16xf32>
    %90 = arith.mulf %89, %88 : vector<2x16xf32>
    %91 = vector.extract_strided_slice %82 {offsets = [0, 16], sizes = [2, 16], strides = [1, 1]} : vector<2x64xf32> to vector<2x16xf32>
    %cst_56 = arith.constant 5.000000e-01 : f32
    %92 = vector.broadcast %cst_56 : f32 to vector<2x16xf32>
    %93 = arith.mulf %92, %91 : vector<2x16xf32>
    %94 = math.tanh %93 : vector<2x16xf32>
    %cst_57 = arith.constant 1.000000e+00 : f32
    %95 = vector.broadcast %cst_57 : f32 to vector<2x16xf32>
    %96 = arith.addf %94, %95 : vector<2x16xf32>
    %cst_58 = arith.constant 5.000000e-01 : f32
    %97 = vector.broadcast %cst_58 : f32 to vector<2x16xf32>
    %98 = arith.mulf %97, %96 : vector<2x16xf32>
    %99 = vector.extract_strided_slice %82 {offsets = [0, 32], sizes = [2, 16], strides = [1, 1]} : vector<2x64xf32> to vector<2x16xf32>
    %100 = math.tanh %99 : vector<2x16xf32>
    %101 = vector.extract_strided_slice %82 {offsets = [0, 48], sizes = [2, 16], strides = [1, 1]} : vector<2x64xf32> to vector<2x16xf32>
    %cst_59 = arith.constant 5.000000e-01 : f32
    %102 = vector.broadcast %cst_59 : f32 to vector<2x16xf32>
    %103 = arith.mulf %102, %101 : vector<2x16xf32>
    %104 = math.tanh %103 : vector<2x16xf32>
    %cst_60 = arith.constant 1.000000e+00 : f32
    %105 = vector.broadcast %cst_60 : f32 to vector<2x16xf32>
    %106 = arith.addf %104, %105 : vector<2x16xf32>
    %cst_61 = arith.constant 5.000000e-01 : f32
    %107 = vector.broadcast %cst_61 : f32 to vector<2x16xf32>
    %108 = arith.mulf %107, %106 : vector<2x16xf32>
    %109 = arith.mulf %98, %36 : vector<2x16xf32>
    %110 = arith.mulf %90, %100 : vector<2x16xf32>
    %111 = arith.addf %109, %110 : vector<2x16xf32>
    %112 = math.tanh %111 : vector<2x16xf32>
    %113 = arith.mulf %108, %112 : vector<2x16xf32>
    %c0_62 = arith.constant 0 : index
    %114 = arith.index_cast %39 : i32 to index
    %c0_63 = arith.constant 0 : index
    %115 = vector.load %arg6[%c0_62, %114, %c0_63] : memref<1x16x16xf32, #tpu.memory_space<vmem>>, vector<1x2x16xf32>
    %116 = vector.shape_cast %115 : vector<1x2x16xf32> to vector<2x16xf32>
    %117 = vector.shape_cast %79 : vector<2x16xf32> to vector<1x2x16xf32>
    tpu.vector_store %arg6[%c0_62, %114, %c0_63], %117 {strides = array<i32>} : memref<1x16x16xf32, #tpu.memory_space<vmem>>, vector<1x2x16xf32>,
    %c0_64 = arith.constant 0 : index
    %118 = arith.index_cast %41 : i32 to index
    %c0_65 = arith.constant 0 : index
    %119 = vector.load %arg7[%c0_64, %118, %c0_65] : memref<1x16x16xf32, #tpu.memory_space<vmem>>, vector<1x2x16xf32>
    %120 = vector.shape_cast %119 : vector<1x2x16xf32> to vector<2x16xf32>
    %121 = vector.shape_cast %113 : vector<2x16xf32> to vector<1x2x16xf32>
    tpu.vector_store %arg7[%c0_64, %118, %c0_65], %121 {strides = array<i32>} : memref<1x16x16xf32, #tpu.memory_space<vmem>>, vector<1x2x16xf32>,
    %c1_i32 = arith.constant 1 : i32
    %c7_i32_66 = arith.constant 7 : i32
    %122 = arith.subi %c7_i32_66, %c1_i32 : i32
    %c2_i32_67 = arith.constant 2 : i32
    %123 = arith.muli %c1_i32, %c2_i32_67 : i32
    %124 = tpu.assume_multiple %123, 2 : i32
    %c2_i32_68 = arith.constant 2 : i32
    %125 = arith.muli %122, %c2_i32_68 : i32
    %126 = tpu.assume_multiple %125, 2 : i32
    %127 = arith.index_cast %124 : i32 to index
    %c0_69 = arith.constant 0 : index
    %128 = vector.load %arg10[%127, %c0_69] : memref<16x64xf32, #tpu.memory_space<vmem>>, vector<2x64xf32>
    %129 = arith.index_cast %126 : i32 to index
    %c0_70 = arith.constant 0 : index
    %130 = vector.load %arg11[%129, %c0_70] : memref<16x64xf32, #tpu.memory_space<vmem>>, vector<2x64xf32>
    %131 = arith.truncf %79 : vector<2x16xf32> to vector<2x16xbf16>
    %cst_71 = arith.constant dense<0.000000e+00> : vector<2x64xf32>
    %132 = tpu.matmul %131, %26, %cst_71 {dimension_numbers = #tpu.dot_dimension_numbers<[1], [0], [0], [1], [0, 0, 1, 1], [], []>} : vector<2x16xbf16>, vector<16x64xbf16>, vector<2x64xf32> -> vector<2x64xf32>
    %133 = arith.addf %128, %132 : vector<2x64xf32>
    %134 = vector.extract_strided_slice %133 {offsets = [0, 0], sizes = [2, 16], strides = [1, 1]} : vector<2x64xf32> to vector<2x16xf32>
    %cst_72 = arith.constant 5.000000e-01 : f32
    %135 = vector.broadcast %cst_72 : f32 to vector<2x16xf32>
    %136 = arith.mulf %135, %134 : vector<2x16xf32>
    %137 = math.tanh %136 : vector<2x16xf32>
    %cst_73 = arith.constant 1.000000e+00 : f32
    %138 = vector.broadcast %cst_73 : f32 to vector<2x16xf32>
    %139 = arith.addf %137, %138 : vector<2x16xf32>
    %cst_74 = arith.constant 5.000000e-01 : f32
    %140 = vector.broadcast %cst_74 : f32 to vector<2x16xf32>
    %141 = arith.mulf %140, %139 : vector<2x16xf32>
    %142 = vector.extract_strided_slice %133 {offsets = [0, 16], sizes = [2, 16], strides = [1, 1]} : vector<2x64xf32> to vector<2x16xf32>
    %cst_75 = arith.constant 5.000000e-01 : f32
    %143 = vector.broadcast %cst_75 : f32 to vector<2x16xf32>
    %144 = arith.mulf %143, %142 : vector<2x16xf32>
    %145 = math.tanh %144 : vector<2x16xf32>
    %cst_76 = arith.constant 1.000000e+00 : f32
    %146 = vector.broadcast %cst_76 : f32 to vector<2x16xf32>
    %147 = arith.addf %145, %146 : vector<2x16xf32>
    %cst_77 = arith.constant 5.000000e-01 : f32
    %148 = vector.broadcast %cst_77 : f32 to vector<2x16xf32>
    %149 = arith.mulf %148, %147 : vector<2x16xf32>
    %150 = vector.extract_strided_slice %133 {offsets = [0, 32], sizes = [2, 16], strides = [1, 1]} : vector<2x64xf32> to vector<2x16xf32>
    %151 = math.tanh %150 : vector<2x16xf32>
    %152 = vector.extract_strided_slice %133 {offsets = [0, 48], sizes = [2, 16], strides = [1, 1]} : vector<2x64xf32> to vector<2x16xf32>
    %cst_78 = arith.constant 5.000000e-01 : f32
    %153 = vector.broadcast %cst_78 : f32 to vector<2x16xf32>
    %154 = arith.mulf %153, %152 : vector<2x16xf32>
    %155 = math.tanh %154 : vector<2x16xf32>
    %cst_79 = arith.constant 1.000000e+00 : f32
    %156 = vector.broadcast %cst_79 : f32 to vector<2x16xf32>
    %157 = arith.addf %155, %156 : vector<2x16xf32>
    %cst_80 = arith.constant 5.000000e-01 : f32
    %158 = vector.broadcast %cst_80 : f32 to vector<2x16xf32>
    %159 = arith.mulf %158, %157 : vector<2x16xf32>
    %160 = arith.mulf %149, %77 : vector<2x16xf32>
    %161 = arith.mulf %141, %151 : vector<2x16xf32>
    %162 = arith.addf %160, %161 : vector<2x16xf32>
    %163 = math.tanh %162 : vector<2x16xf32>
    %164 = arith.mulf %159, %163 : vector<2x16xf32>
    %165 = arith.truncf %113 : vector<2x16xf32> to vector<2x16xbf16>
    %cst_81 = arith.constant dense<0.000000e+00> : vector<2x64xf32>
    %166 = tpu.matmul %165, %28, %cst_81 {dimension_numbers = #tpu.dot_dimension_numbers<[1], [0], [0], [1], [0, 0, 1, 1], [], []>} : vector<2x16xbf16>, vector<16x64xbf16>, vector<2x64xf32> -> vector<2x64xf32>
    %167 = arith.addf %130, %166 : vector<2x64xf32>
    %168 = vector.extract_strided_slice %167 {offsets = [0, 0], sizes = [2, 16], strides = [1, 1]} : vector<2x64xf32> to vector<2x16xf32>
    %cst_82 = arith.constant 5.000000e-01 : f32
    %169 = vector.broadcast %cst_82 : f32 to vector<2x16xf32>
    %170 = arith.mulf %169, %168 : vector<2x16xf32>
    %171 = math.tanh %170 : vector<2x16xf32>
    %cst_83 = arith.constant 1.000000e+00 : f32
    %172 = vector.broadcast %cst_83 : f32 to vector<2x16xf32>
    %173 = arith.addf %171, %172 : vector<2x16xf32>
    %cst_84 = arith.constant 5.000000e-01 : f32
    %174 = vector.broadcast %cst_84 : f32 to vector<2x16xf32>
    %175 = arith.mulf %174, %173 : vector<2x16xf32>
    %176 = vector.extract_strided_slice %167 {offsets = [0, 16], sizes = [2, 16], strides = [1, 1]} : vector<2x64xf32> to vector<2x16xf32>
    %cst_85 = arith.constant 5.000000e-01 : f32
    %177 = vector.broadcast %cst_85 : f32 to vector<2x16xf32>
    %178 = arith.mulf %177, %176 : vector<2x16xf32>
    %179 = math.tanh %178 : vector<2x16xf32>
    %cst_86 = arith.constant 1.000000e+00 : f32
    %180 = vector.broadcast %cst_86 : f32 to vector<2x16xf32>
    %181 = arith.addf %179, %180 : vector<2x16xf32>
    %cst_87 = arith.constant 5.000000e-01 : f32
    %182 = vector.broadcast %cst_87 : f32 to vector<2x16xf32>
    %183 = arith.mulf %182, %181 : vector<2x16xf32>
    %184 = vector.extract_strided_slice %167 {offsets = [0, 32], sizes = [2, 16], strides = [1, 1]} : vector<2x64xf32> to vector<2x16xf32>
    %185 = math.tanh %184 : vector<2x16xf32>
    %186 = vector.extract_strided_slice %167 {offsets = [0, 48], sizes = [2, 16], strides = [1, 1]} : vector<2x64xf32> to vector<2x16xf32>
    %cst_88 = arith.constant 5.000000e-01 : f32
    %187 = vector.broadcast %cst_88 : f32 to vector<2x16xf32>
    %188 = arith.mulf %187, %186 : vector<2x16xf32>
    %189 = math.tanh %188 : vector<2x16xf32>
    %cst_89 = arith.constant 1.000000e+00 : f32
    %190 = vector.broadcast %cst_89 : f32 to vector<2x16xf32>
    %191 = arith.addf %189, %190 : vector<2x16xf32>
    %cst_90 = arith.constant 5.000000e-01 : f32
    %192 = vector.broadcast %cst_90 : f32 to vector<2x16xf32>
    %193 = arith.mulf %192, %191 : vector<2x16xf32>
    %194 = arith.mulf %183, %111 : vector<2x16xf32>
    %195 = arith.mulf %175, %185 : vector<2x16xf32>
    %196 = arith.addf %194, %195 : vector<2x16xf32>
    %197 = math.tanh %196 : vector<2x16xf32>
    %198 = arith.mulf %193, %197 : vector<2x16xf32>
    %c0_91 = arith.constant 0 : index
    %199 = arith.index_cast %124 : i32 to index
    %c0_92 = arith.constant 0 : index
    %200 = vector.load %arg6[%c0_91, %199, %c0_92] : memref<1x16x16xf32, #tpu.memory_space<vmem>>, vector<1x2x16xf32>
    %201 = vector.shape_cast %200 : vector<1x2x16xf32> to vector<2x16xf32>
    %202 = vector.shape_cast %164 : vector<2x16xf32> to vector<1x2x16xf32>
    tpu.vector_store %arg6[%c0_91, %199, %c0_92], %202 {strides = array<i32>} : memref<1x16x16xf32, #tpu.memory_space<vmem>>, vector<1x2x16xf32>,
    %c0_93 = arith.constant 0 : index
    %203 = arith.index_cast %126 : i32 to index
    %c0_94 = arith.constant 0 : index
    %204 = vector.load %arg7[%c0_93, %203, %c0_94] : memref<1x16x16xf32, #tpu.memory_space<vmem>>, vector<1x2x16xf32>
    %205 = vector.shape_cast %204 : vector<1x2x16xf32> to vector<2x16xf32>
    %206 = vector.shape_cast %198 : vector<2x16xf32> to vector<1x2x16xf32>
    tpu.vector_store %arg7[%c0_93, %203, %c0_94], %206 {strides = array<i32>} : memref<1x16x16xf32, #tpu.memory_space<vmem>>, vector<1x2x16xf32>,
    %c2_i32_95 = arith.constant 2 : i32
    %c7_i32_96 = arith.constant 7 : i32
    %207 = arith.subi %c7_i32_96, %c2_i32_95 : i32
    %c2_i32_97 = arith.constant 2 : i32
    %208 = arith.muli %c2_i32_95, %c2_i32_97 : i32
    %209 = tpu.assume_multiple %208, 2 : i32
    %c2_i32_98 = arith.constant 2 : i32
    %210 = arith.muli %207, %c2_i32_98 : i32
    %211 = tpu.assume_multiple %210, 2 : i32
    %212 = arith.index_cast %209 : i32 to index
    %c0_99 = arith.constant 0 : index
    %213 = vector.load %arg10[%212, %c0_99] : memref<16x64xf32, #tpu.memory_space<vmem>>, vector<2x64xf32>
    %214 = arith.index_cast %211 : i32 to index
    %c0_100 = arith.constant 0 : index
    %215 = vector.load %arg11[%214, %c0_100] : memref<16x64xf32, #tpu.memory_space<vmem>>, vector<2x64xf32>
    %216 = arith.truncf %164 : vector<2x16xf32> to vector<2x16xbf16>
    %cst_101 = arith.constant dense<0.000000e+00> : vector<2x64xf32>
    %217 = tpu.matmul %216, %26, %cst_101 {dimension_numbers = #tpu.dot_dimension_numbers<[1], [0], [0], [1], [0, 0, 1, 1], [], []>} : vector<2x16xbf16>, vector<16x64xbf16>, vector<2x64xf32> -> vector<2x64xf32>
    %218 = arith.addf %213, %217 : vector<2x64xf32>
    %219 = vector.extract_strided_slice %218 {offsets = [0, 0], sizes = [2, 16], strides = [1, 1]} : vector<2x64xf32> to vector<2x16xf32>
    %cst_102 = arith.constant 5.000000e-01 : f32
    %220 = vector.broadcast %cst_102 : f32 to vector<2x16xf32>
    %221 = arith.mulf %220, %219 : vector<2x16xf32>
    %222 = math.tanh %221 : vector<2x16xf32>
    %cst_103 = arith.constant 1.000000e+00 : f32
    %223 = vector.broadcast %cst_103 : f32 to vector<2x16xf32>
    %224 = arith.addf %222, %223 : vector<2x16xf32>
    %cst_104 = arith.constant 5.000000e-01 : f32
    %225 = vector.broadcast %cst_104 : f32 to vector<2x16xf32>
    %226 = arith.mulf %225, %224 : vector<2x16xf32>
    %227 = vector.extract_strided_slice %218 {offsets = [0, 16], sizes = [2, 16], strides = [1, 1]} : vector<2x64xf32> to vector<2x16xf32>
    %cst_105 = arith.constant 5.000000e-01 : f32
    %228 = vector.broadcast %cst_105 : f32 to vector<2x16xf32>
    %229 = arith.mulf %228, %227 : vector<2x16xf32>
    %230 = math.tanh %229 : vector<2x16xf32>
    %cst_106 = arith.constant 1.000000e+00 : f32
    %231 = vector.broadcast %cst_106 : f32 to vector<2x16xf32>
    %232 = arith.addf %230, %231 : vector<2x16xf32>
    %cst_107 = arith.constant 5.000000e-01 : f32
    %233 = vector.broadcast %cst_107 : f32 to vector<2x16xf32>
    %234 = arith.mulf %233, %232 : vector<2x16xf32>
    %235 = vector.extract_strided_slice %218 {offsets = [0, 32], sizes = [2, 16], strides = [1, 1]} : vector<2x64xf32> to vector<2x16xf32>
    %236 = math.tanh %235 : vector<2x16xf32>
    %237 = vector.extract_strided_slice %218 {offsets = [0, 48], sizes = [2, 16], strides = [1, 1]} : vector<2x64xf32> to vector<2x16xf32>
    %cst_108 = arith.constant 5.000000e-01 : f32
    %238 = vector.broadcast %cst_108 : f32 to vector<2x16xf32>
    %239 = arith.mulf %238, %237 : vector<2x16xf32>
    %240 = math.tanh %239 : vector<2x16xf32>
    %cst_109 = arith.constant 1.000000e+00 : f32
    %241 = vector.broadcast %cst_109 : f32 to vector<2x16xf32>
    %242 = arith.addf %240, %241 : vector<2x16xf32>
    %cst_110 = arith.constant 5.000000e-01 : f32
    %243 = vector.broadcast %cst_110 : f32 to vector<2x16xf32>
    %244 = arith.mulf %243, %242 : vector<2x16xf32>
    %245 = arith.mulf %234, %162 : vector<2x16xf32>
    %246 = arith.mulf %226, %236 : vector<2x16xf32>
    %247 = arith.addf %245, %246 : vector<2x16xf32>
    %248 = math.tanh %247 : vector<2x16xf32>
    %249 = arith.mulf %244, %248 : vector<2x16xf32>
    %250 = arith.truncf %198 : vector<2x16xf32> to vector<2x16xbf16>
    %cst_111 = arith.constant dense<0.000000e+00> : vector<2x64xf32>
    %251 = tpu.matmul %250, %28, %cst_111 {dimension_numbers = #tpu.dot_dimension_numbers<[1], [0], [0], [1], [0, 0, 1, 1], [], []>} : vector<2x16xbf16>, vector<16x64xbf16>, vector<2x64xf32> -> vector<2x64xf32>
    %252 = arith.addf %215, %251 : vector<2x64xf32>
    %253 = vector.extract_strided_slice %252 {offsets = [0, 0], sizes = [2, 16], strides = [1, 1]} : vector<2x64xf32> to vector<2x16xf32>
    %cst_112 = arith.constant 5.000000e-01 : f32
    %254 = vector.broadcast %cst_112 : f32 to vector<2x16xf32>
    %255 = arith.mulf %254, %253 : vector<2x16xf32>
    %256 = math.tanh %255 : vector<2x16xf32>
    %cst_113 = arith.constant 1.000000e+00 : f32
    %257 = vector.broadcast %cst_113 : f32 to vector<2x16xf32>
    %258 = arith.addf %256, %257 : vector<2x16xf32>
    %cst_114 = arith.constant 5.000000e-01 : f32
    %259 = vector.broadcast %cst_114 : f32 to vector<2x16xf32>
    %260 = arith.mulf %259, %258 : vector<2x16xf32>
    %261 = vector.extract_strided_slice %252 {offsets = [0, 16], sizes = [2, 16], strides = [1, 1]} : vector<2x64xf32> to vector<2x16xf32>
    %cst_115 = arith.constant 5.000000e-01 : f32
    %262 = vector.broadcast %cst_115 : f32 to vector<2x16xf32>
    %263 = arith.mulf %262, %261 : vector<2x16xf32>
    %264 = math.tanh %263 : vector<2x16xf32>
    %cst_116 = arith.constant 1.000000e+00 : f32
    %265 = vector.broadcast %cst_116 : f32 to vector<2x16xf32>
    %266 = arith.addf %264, %265 : vector<2x16xf32>
    %cst_117 = arith.constant 5.000000e-01 : f32
    %267 = vector.broadcast %cst_117 : f32 to vector<2x16xf32>
    %268 = arith.mulf %267, %266 : vector<2x16xf32>
    %269 = vector.extract_strided_slice %252 {offsets = [0, 32], sizes = [2, 16], strides = [1, 1]} : vector<2x64xf32> to vector<2x16xf32>
    %270 = math.tanh %269 : vector<2x16xf32>
    %271 = vector.extract_strided_slice %252 {offsets = [0, 48], sizes = [2, 16], strides = [1, 1]} : vector<2x64xf32> to vector<2x16xf32>
    %cst_118 = arith.constant 5.000000e-01 : f32
    %272 = vector.broadcast %cst_118 : f32 to vector<2x16xf32>
    %273 = arith.mulf %272, %271 : vector<2x16xf32>
    %274 = math.tanh %273 : vector<2x16xf32>
    %cst_119 = arith.constant 1.000000e+00 : f32
    %275 = vector.broadcast %cst_119 : f32 to vector<2x16xf32>
    %276 = arith.addf %274, %275 : vector<2x16xf32>
    %cst_120 = arith.constant 5.000000e-01 : f32
    %277 = vector.broadcast %cst_120 : f32 to vector<2x16xf32>
    %278 = arith.mulf %277, %276 : vector<2x16xf32>
    %279 = arith.mulf %268, %196 : vector<2x16xf32>
    %280 = arith.mulf %260, %270 : vector<2x16xf32>
    %281 = arith.addf %279, %280 : vector<2x16xf32>
    %282 = math.tanh %281 : vector<2x16xf32>
    %283 = arith.mulf %278, %282 : vector<2x16xf32>
    %c0_121 = arith.constant 0 : index
    %284 = arith.index_cast %209 : i32 to index
    %c0_122 = arith.constant 0 : index
    %285 = vector.load %arg6[%c0_121, %284, %c0_122] : memref<1x16x16xf32, #tpu.memory_space<vmem>>, vector<1x2x16xf32>
    %286 = vector.shape_cast %285 : vector<1x2x16xf32> to vector<2x16xf32>
    %287 = vector.shape_cast %249 : vector<2x16xf32> to vector<1x2x16xf32>
    tpu.vector_store %arg6[%c0_121, %284, %c0_122], %287 {strides = array<i32>} : memref<1x16x16xf32, #tpu.memory_space<vmem>>, vector<1x2x16xf32>,
    %c0_123 = arith.constant 0 : index
    %288 = arith.index_cast %211 : i32 to index
    %c0_124 = arith.constant 0 : index
    %289 = vector.load %arg7[%c0_123, %288, %c0_124] : memref<1x16x16xf32, #tpu.memory_space<vmem>>, vector<1x2x16xf32>
    %290 = vector.shape_cast %289 : vector<1x2x16xf32> to vector<2x16xf32>
    %291 = vector.shape_cast %283 : vector<2x16xf32> to vector<1x2x16xf32>
    tpu.vector_store %arg7[%c0_123, %288, %c0_124], %291 {strides = array<i32>} : memref<1x16x16xf32, #tpu.memory_space<vmem>>, vector<1x2x16xf32>,
    %c3_i32 = arith.constant 3 : i32
    %c7_i32_125 = arith.constant 7 : i32
    %292 = arith.subi %c7_i32_125, %c3_i32 : i32
    %c2_i32_126 = arith.constant 2 : i32
    %293 = arith.muli %c3_i32, %c2_i32_126 : i32
    %294 = tpu.assume_multiple %293, 2 : i32
    %c2_i32_127 = arith.constant 2 : i32
    %295 = arith.muli %292, %c2_i32_127 : i32
    %296 = tpu.assume_multiple %295, 2 : i32
    %297 = arith.index_cast %294 : i32 to index
    %c0_128 = arith.constant 0 : index
    %298 = vector.load %arg10[%297, %c0_128] : memref<16x64xf32, #tpu.memory_space<vmem>>, vector<2x64xf32>
    %299 = arith.index_cast %296 : i32 to index
    %c0_129 = arith.constant 0 : index
    %300 = vector.load %arg11[%299, %c0_129] : memref<16x64xf32, #tpu.memory_space<vmem>>, vector<2x64xf32>
    %301 = arith.truncf %249 : vector<2x16xf32> to vector<2x16xbf16>
    %cst_130 = arith.constant dense<0.000000e+00> : vector<2x64xf32>
    %302 = tpu.matmul %301, %26, %cst_130 {dimension_numbers = #tpu.dot_dimension_numbers<[1], [0], [0], [1], [0, 0, 1, 1], [], []>} : vector<2x16xbf16>, vector<16x64xbf16>, vector<2x64xf32> -> vector<2x64xf32>
    %303 = arith.addf %298, %302 : vector<2x64xf32>
    %304 = vector.extract_strided_slice %303 {offsets = [0, 0], sizes = [2, 16], strides = [1, 1]} : vector<2x64xf32> to vector<2x16xf32>
    %cst_131 = arith.constant 5.000000e-01 : f32
    %305 = vector.broadcast %cst_131 : f32 to vector<2x16xf32>
    %306 = arith.mulf %305, %304 : vector<2x16xf32>
    %307 = math.tanh %306 : vector<2x16xf32>
    %cst_132 = arith.constant 1.000000e+00 : f32
    %308 = vector.broadcast %cst_132 : f32 to vector<2x16xf32>
    %309 = arith.addf %307, %308 : vector<2x16xf32>
    %cst_133 = arith.constant 5.000000e-01 : f32
    %310 = vector.broadcast %cst_133 : f32 to vector<2x16xf32>
    %311 = arith.mulf %310, %309 : vector<2x16xf32>
    %312 = vector.extract_strided_slice %303 {offsets = [0, 16], sizes = [2, 16], strides = [1, 1]} : vector<2x64xf32> to vector<2x16xf32>
    %cst_134 = arith.constant 5.000000e-01 : f32
    %313 = vector.broadcast %cst_134 : f32 to vector<2x16xf32>
    %314 = arith.mulf %313, %312 : vector<2x16xf32>
    %315 = math.tanh %314 : vector<2x16xf32>
    %cst_135 = arith.constant 1.000000e+00 : f32
    %316 = vector.broadcast %cst_135 : f32 to vector<2x16xf32>
    %317 = arith.addf %315, %316 : vector<2x16xf32>
    %cst_136 = arith.constant 5.000000e-01 : f32
    %318 = vector.broadcast %cst_136 : f32 to vector<2x16xf32>
    %319 = arith.mulf %318, %317 : vector<2x16xf32>
    %320 = vector.extract_strided_slice %303 {offsets = [0, 32], sizes = [2, 16], strides = [1, 1]} : vector<2x64xf32> to vector<2x16xf32>
    %321 = math.tanh %320 : vector<2x16xf32>
    %322 = vector.extract_strided_slice %303 {offsets = [0, 48], sizes = [2, 16], strides = [1, 1]} : vector<2x64xf32> to vector<2x16xf32>
    %cst_137 = arith.constant 5.000000e-01 : f32
    %323 = vector.broadcast %cst_137 : f32 to vector<2x16xf32>
    %324 = arith.mulf %323, %322 : vector<2x16xf32>
    %325 = math.tanh %324 : vector<2x16xf32>
    %cst_138 = arith.constant 1.000000e+00 : f32
    %326 = vector.broadcast %cst_138 : f32 to vector<2x16xf32>
    %327 = arith.addf %325, %326 : vector<2x16xf32>
    %cst_139 = arith.constant 5.000000e-01 : f32
    %328 = vector.broadcast %cst_139 : f32 to vector<2x16xf32>
    %329 = arith.mulf %328, %327 : vector<2x16xf32>
    %330 = arith.mulf %319, %247 : vector<2x16xf32>
    %331 = arith.mulf %311, %321 : vector<2x16xf32>
    %332 = arith.addf %330, %331 : vector<2x16xf32>
    %333 = math.tanh %332 : vector<2x16xf32>
    %334 = arith.mulf %329, %333 : vector<2x16xf32>
    %335 = arith.truncf %283 : vector<2x16xf32> to vector<2x16xbf16>
    %cst_140 = arith.constant dense<0.000000e+00> : vector<2x64xf32>
    %336 = tpu.matmul %335, %28, %cst_140 {dimension_numbers = #tpu.dot_dimension_numbers<[1], [0], [0], [1], [0, 0, 1, 1], [], []>} : vector<2x16xbf16>, vector<16x64xbf16>, vector<2x64xf32> -> vector<2x64xf32>
    %337 = arith.addf %300, %336 : vector<2x64xf32>
    %338 = vector.extract_strided_slice %337 {offsets = [0, 0], sizes = [2, 16], strides = [1, 1]} : vector<2x64xf32> to vector<2x16xf32>
    %cst_141 = arith.constant 5.000000e-01 : f32
    %339 = vector.broadcast %cst_141 : f32 to vector<2x16xf32>
    %340 = arith.mulf %339, %338 : vector<2x16xf32>
    %341 = math.tanh %340 : vector<2x16xf32>
    %cst_142 = arith.constant 1.000000e+00 : f32
    %342 = vector.broadcast %cst_142 : f32 to vector<2x16xf32>
    %343 = arith.addf %341, %342 : vector<2x16xf32>
    %cst_143 = arith.constant 5.000000e-01 : f32
    %344 = vector.broadcast %cst_143 : f32 to vector<2x16xf32>
    %345 = arith.mulf %344, %343 : vector<2x16xf32>
    %346 = vector.extract_strided_slice %337 {offsets = [0, 16], sizes = [2, 16], strides = [1, 1]} : vector<2x64xf32> to vector<2x16xf32>
    %cst_144 = arith.constant 5.000000e-01 : f32
    %347 = vector.broadcast %cst_144 : f32 to vector<2x16xf32>
    %348 = arith.mulf %347, %346 : vector<2x16xf32>
    %349 = math.tanh %348 : vector<2x16xf32>
    %cst_145 = arith.constant 1.000000e+00 : f32
    %350 = vector.broadcast %cst_145 : f32 to vector<2x16xf32>
    %351 = arith.addf %349, %350 : vector<2x16xf32>
    %cst_146 = arith.constant 5.000000e-01 : f32
    %352 = vector.broadcast %cst_146 : f32 to vector<2x16xf32>
    %353 = arith.mulf %352, %351 : vector<2x16xf32>
    %354 = vector.extract_strided_slice %337 {offsets = [0, 32], sizes = [2, 16], strides = [1, 1]} : vector<2x64xf32> to vector<2x16xf32>
    %355 = math.tanh %354 : vector<2x16xf32>
    %356 = vector.extract_strided_slice %337 {offsets = [0, 48], sizes = [2, 16], strides = [1, 1]} : vector<2x64xf32> to vector<2x16xf32>
    %cst_147 = arith.constant 5.000000e-01 : f32
    %357 = vector.broadcast %cst_147 : f32 to vector<2x16xf32>
    %358 = arith.mulf %357, %356 : vector<2x16xf32>
    %359 = math.tanh %358 : vector<2x16xf32>
    %cst_148 = arith.constant 1.000000e+00 : f32
    %360 = vector.broadcast %cst_148 : f32 to vector<2x16xf32>
    %361 = arith.addf %359, %360 : vector<2x16xf32>
    %cst_149 = arith.constant 5.000000e-01 : f32
    %362 = vector.broadcast %cst_149 : f32 to vector<2x16xf32>
    %363 = arith.mulf %362, %361 : vector<2x16xf32>
    %364 = arith.mulf %353, %281 : vector<2x16xf32>
    %365 = arith.mulf %345, %355 : vector<2x16xf32>
    %366 = arith.addf %364, %365 : vector<2x16xf32>
    %367 = math.tanh %366 : vector<2x16xf32>
    %368 = arith.mulf %363, %367 : vector<2x16xf32>
    %c0_150 = arith.constant 0 : index
    %369 = arith.index_cast %294 : i32 to index
    %c0_151 = arith.constant 0 : index
    %370 = vector.load %arg6[%c0_150, %369, %c0_151] : memref<1x16x16xf32, #tpu.memory_space<vmem>>, vector<1x2x16xf32>
    %371 = vector.shape_cast %370 : vector<1x2x16xf32> to vector<2x16xf32>
    %372 = vector.shape_cast %334 : vector<2x16xf32> to vector<1x2x16xf32>
    tpu.vector_store %arg6[%c0_150, %369, %c0_151], %372 {strides = array<i32>} : memref<1x16x16xf32, #tpu.memory_space<vmem>>, vector<1x2x16xf32>,
    %c0_152 = arith.constant 0 : index
    %373 = arith.index_cast %296 : i32 to index
    %c0_153 = arith.constant 0 : index
    %374 = vector.load %arg7[%c0_152, %373, %c0_153] : memref<1x16x16xf32, #tpu.memory_space<vmem>>, vector<1x2x16xf32>
    %375 = vector.shape_cast %374 : vector<1x2x16xf32> to vector<2x16xf32>
    %376 = vector.shape_cast %368 : vector<2x16xf32> to vector<1x2x16xf32>
    tpu.vector_store %arg7[%c0_152, %373, %c0_153], %376 {strides = array<i32>} : memref<1x16x16xf32, #tpu.memory_space<vmem>>, vector<1x2x16xf32>,
    %c4_i32 = arith.constant 4 : i32
    %c7_i32_154 = arith.constant 7 : i32
    %377 = arith.subi %c7_i32_154, %c4_i32 : i32
    %c2_i32_155 = arith.constant 2 : i32
    %378 = arith.muli %c4_i32, %c2_i32_155 : i32
    %379 = tpu.assume_multiple %378, 2 : i32
    %c2_i32_156 = arith.constant 2 : i32
    %380 = arith.muli %377, %c2_i32_156 : i32
    %381 = tpu.assume_multiple %380, 2 : i32
    %382 = arith.index_cast %379 : i32 to index
    %c0_157 = arith.constant 0 : index
    %383 = vector.load %arg10[%382, %c0_157] : memref<16x64xf32, #tpu.memory_space<vmem>>, vector<2x64xf32>
    %384 = arith.index_cast %381 : i32 to index
    %c0_158 = arith.constant 0 : index
    %385 = vector.load %arg11[%384, %c0_158] : memref<16x64xf32, #tpu.memory_space<vmem>>, vector<2x64xf32>
    %386 = arith.truncf %334 : vector<2x16xf32> to vector<2x16xbf16>
    %cst_159 = arith.constant dense<0.000000e+00> : vector<2x64xf32>
    %387 = tpu.matmul %386, %26, %cst_159 {dimension_numbers = #tpu.dot_dimension_numbers<[1], [0], [0], [1], [0, 0, 1, 1], [], []>} : vector<2x16xbf16>, vector<16x64xbf16>, vector<2x64xf32> -> vector<2x64xf32>
    %388 = arith.addf %383, %387 : vector<2x64xf32>
    %389 = vector.extract_strided_slice %388 {offsets = [0, 0], sizes = [2, 16], strides = [1, 1]} : vector<2x64xf32> to vector<2x16xf32>
    %cst_160 = arith.constant 5.000000e-01 : f32
    %390 = vector.broadcast %cst_160 : f32 to vector<2x16xf32>
    %391 = arith.mulf %390, %389 : vector<2x16xf32>
    %392 = math.tanh %391 : vector<2x16xf32>
    %cst_161 = arith.constant 1.000000e+00 : f32
    %393 = vector.broadcast %cst_161 : f32 to vector<2x16xf32>
    %394 = arith.addf %392, %393 : vector<2x16xf32>
    %cst_162 = arith.constant 5.000000e-01 : f32
    %395 = vector.broadcast %cst_162 : f32 to vector<2x16xf32>
    %396 = arith.mulf %395, %394 : vector<2x16xf32>
    %397 = vector.extract_strided_slice %388 {offsets = [0, 16], sizes = [2, 16], strides = [1, 1]} : vector<2x64xf32> to vector<2x16xf32>
    %cst_163 = arith.constant 5.000000e-01 : f32
    %398 = vector.broadcast %cst_163 : f32 to vector<2x16xf32>
    %399 = arith.mulf %398, %397 : vector<2x16xf32>
    %400 = math.tanh %399 : vector<2x16xf32>
    %cst_164 = arith.constant 1.000000e+00 : f32
    %401 = vector.broadcast %cst_164 : f32 to vector<2x16xf32>
    %402 = arith.addf %400, %401 : vector<2x16xf32>
    %cst_165 = arith.constant 5.000000e-01 : f32
    %403 = vector.broadcast %cst_165 : f32 to vector<2x16xf32>
    %404 = arith.mulf %403, %402 : vector<2x16xf32>
    %405 = vector.extract_strided_slice %388 {offsets = [0, 32], sizes = [2, 16], strides = [1, 1]} : vector<2x64xf32> to vector<2x16xf32>
    %406 = math.tanh %405 : vector<2x16xf32>
    %407 = vector.extract_strided_slice %388 {offsets = [0, 48], sizes = [2, 16], strides = [1, 1]} : vector<2x64xf32> to vector<2x16xf32>
    %cst_166 = arith.constant 5.000000e-01 : f32
    %408 = vector.broadcast %cst_166 : f32 to vector<2x16xf32>
    %409 = arith.mulf %408, %407 : vector<2x16xf32>
    %410 = math.tanh %409 : vector<2x16xf32>
    %cst_167 = arith.constant 1.000000e+00 : f32
    %411 = vector.broadcast %cst_167 : f32 to vector<2x16xf32>
    %412 = arith.addf %410, %411 : vector<2x16xf32>
    %cst_168 = arith.constant 5.000000e-01 : f32
    %413 = vector.broadcast %cst_168 : f32 to vector<2x16xf32>
    %414 = arith.mulf %413, %412 : vector<2x16xf32>
    %415 = arith.mulf %404, %332 : vector<2x16xf32>
    %416 = arith.mulf %396, %406 : vector<2x16xf32>
    %417 = arith.addf %415, %416 : vector<2x16xf32>
    %418 = math.tanh %417 : vector<2x16xf32>
    %419 = arith.mulf %414, %418 : vector<2x16xf32>
    %420 = arith.truncf %368 : vector<2x16xf32> to vector<2x16xbf16>
    %cst_169 = arith.constant dense<0.000000e+00> : vector<2x64xf32>
    %421 = tpu.matmul %420, %28, %cst_169 {dimension_numbers = #tpu.dot_dimension_numbers<[1], [0], [0], [1], [0, 0, 1, 1], [], []>} : vector<2x16xbf16>, vector<16x64xbf16>, vector<2x64xf32> -> vector<2x64xf32>
    %422 = arith.addf %385, %421 : vector<2x64xf32>
    %423 = vector.extract_strided_slice %422 {offsets = [0, 0], sizes = [2, 16], strides = [1, 1]} : vector<2x64xf32> to vector<2x16xf32>
    %cst_170 = arith.constant 5.000000e-01 : f32
    %424 = vector.broadcast %cst_170 : f32 to vector<2x16xf32>
    %425 = arith.mulf %424, %423 : vector<2x16xf32>
    %426 = math.tanh %425 : vector<2x16xf32>
    %cst_171 = arith.constant 1.000000e+00 : f32
    %427 = vector.broadcast %cst_171 : f32 to vector<2x16xf32>
    %428 = arith.addf %426, %427 : vector<2x16xf32>
    %cst_172 = arith.constant 5.000000e-01 : f32
    %429 = vector.broadcast %cst_172 : f32 to vector<2x16xf32>
    %430 = arith.mulf %429, %428 : vector<2x16xf32>
    %431 = vector.extract_strided_slice %422 {offsets = [0, 16], sizes = [2, 16], strides = [1, 1]} : vector<2x64xf32> to vector<2x16xf32>
    %cst_173 = arith.constant 5.000000e-01 : f32
    %432 = vector.broadcast %cst_173 : f32 to vector<2x16xf32>
    %433 = arith.mulf %432, %431 : vector<2x16xf32>
    %434 = math.tanh %433 : vector<2x16xf32>
    %cst_174 = arith.constant 1.000000e+00 : f32
    %435 = vector.broadcast %cst_174 : f32 to vector<2x16xf32>
    %436 = arith.addf %434, %435 : vector<2x16xf32>
    %cst_175 = arith.constant 5.000000e-01 : f32
    %437 = vector.broadcast %cst_175 : f32 to vector<2x16xf32>
    %438 = arith.mulf %437, %436 : vector<2x16xf32>
    %439 = vector.extract_strided_slice %422 {offsets = [0, 32], sizes = [2, 16], strides = [1, 1]} : vector<2x64xf32> to vector<2x16xf32>
    %440 = math.tanh %439 : vector<2x16xf32>
    %441 = vector.extract_strided_slice %422 {offsets = [0, 48], sizes = [2, 16], strides = [1, 1]} : vector<2x64xf32> to vector<2x16xf32>
    %cst_176 = arith.constant 5.000000e-01 : f32
    %442 = vector.broadcast %cst_176 : f32 to vector<2x16xf32>
    %443 = arith.mulf %442, %441 : vector<2x16xf32>
    %444 = math.tanh %443 : vector<2x16xf32>
    %cst_177 = arith.constant 1.000000e+00 : f32
    %445 = vector.broadcast %cst_177 : f32 to vector<2x16xf32>
    %446 = arith.addf %444, %445 : vector<2x16xf32>
    %cst_178 = arith.constant 5.000000e-01 : f32
    %447 = vector.broadcast %cst_178 : f32 to vector<2x16xf32>
    %448 = arith.mulf %447, %446 : vector<2x16xf32>
    %449 = arith.mulf %438, %366 : vector<2x16xf32>
    %450 = arith.mulf %430, %440 : vector<2x16xf32>
    %451 = arith.addf %449, %450 : vector<2x16xf32>
    %452 = math.tanh %451 : vector<2x16xf32>
    %453 = arith.mulf %448, %452 : vector<2x16xf32>
    %c0_179 = arith.constant 0 : index
    %454 = arith.index_cast %379 : i32 to index
    %c0_180 = arith.constant 0 : index
    %455 = vector.load %arg6[%c0_179, %454, %c0_180] : memref<1x16x16xf32, #tpu.memory_space<vmem>>, vector<1x2x16xf32>
    %456 = vector.shape_cast %455 : vector<1x2x16xf32> to vector<2x16xf32>
    %457 = vector.shape_cast %419 : vector<2x16xf32> to vector<1x2x16xf32>
    tpu.vector_store %arg6[%c0_179, %454, %c0_180], %457 {strides = array<i32>} : memref<1x16x16xf32, #tpu.memory_space<vmem>>, vector<1x2x16xf32>,
    %c0_181 = arith.constant 0 : index
    %458 = arith.index_cast %381 : i32 to index
    %c0_182 = arith.constant 0 : index
    %459 = vector.load %arg7[%c0_181, %458, %c0_182] : memref<1x16x16xf32, #tpu.memory_space<vmem>>, vector<1x2x16xf32>
    %460 = vector.shape_cast %459 : vector<1x2x16xf32> to vector<2x16xf32>
    %461 = vector.shape_cast %453 : vector<2x16xf32> to vector<1x2x16xf32>
    tpu.vector_store %arg7[%c0_181, %458, %c0_182], %461 {strides = array<i32>} : memref<1x16x16xf32, #tpu.memory_space<vmem>>, vector<1x2x16xf32>,
    %c5_i32 = arith.constant 5 : i32
    %c7_i32_183 = arith.constant 7 : i32
    %462 = arith.subi %c7_i32_183, %c5_i32 : i32
    %c2_i32_184 = arith.constant 2 : i32
    %463 = arith.muli %c5_i32, %c2_i32_184 : i32
    %464 = tpu.assume_multiple %463, 2 : i32
    %c2_i32_185 = arith.constant 2 : i32
    %465 = arith.muli %462, %c2_i32_185 : i32
    %466 = tpu.assume_multiple %465, 2 : i32
    %467 = arith.index_cast %464 : i32 to index
    %c0_186 = arith.constant 0 : index
    %468 = vector.load %arg10[%467, %c0_186] : memref<16x64xf32, #tpu.memory_space<vmem>>, vector<2x64xf32>
    %469 = arith.index_cast %466 : i32 to index
    %c0_187 = arith.constant 0 : index
    %470 = vector.load %arg11[%469, %c0_187] : memref<16x64xf32, #tpu.memory_space<vmem>>, vector<2x64xf32>
    %471 = arith.truncf %419 : vector<2x16xf32> to vector<2x16xbf16>
    %cst_188 = arith.constant dense<0.000000e+00> : vector<2x64xf32>
    %472 = tpu.matmul %471, %26, %cst_188 {dimension_numbers = #tpu.dot_dimension_numbers<[1], [0], [0], [1], [0, 0, 1, 1], [], []>} : vector<2x16xbf16>, vector<16x64xbf16>, vector<2x64xf32> -> vector<2x64xf32>
    %473 = arith.addf %468, %472 : vector<2x64xf32>
    %474 = vector.extract_strided_slice %473 {offsets = [0, 0], sizes = [2, 16], strides = [1, 1]} : vector<2x64xf32> to vector<2x16xf32>
    %cst_189 = arith.constant 5.000000e-01 : f32
    %475 = vector.broadcast %cst_189 : f32 to vector<2x16xf32>
    %476 = arith.mulf %475, %474 : vector<2x16xf32>
    %477 = math.tanh %476 : vector<2x16xf32>
    %cst_190 = arith.constant 1.000000e+00 : f32
    %478 = vector.broadcast %cst_190 : f32 to vector<2x16xf32>
    %479 = arith.addf %477, %478 : vector<2x16xf32>
    %cst_191 = arith.constant 5.000000e-01 : f32
    %480 = vector.broadcast %cst_191 : f32 to vector<2x16xf32>
    %481 = arith.mulf %480, %479 : vector<2x16xf32>
    %482 = vector.extract_strided_slice %473 {offsets = [0, 16], sizes = [2, 16], strides = [1, 1]} : vector<2x64xf32> to vector<2x16xf32>
    %cst_192 = arith.constant 5.000000e-01 : f32
    %483 = vector.broadcast %cst_192 : f32 to vector<2x16xf32>
    %484 = arith.mulf %483, %482 : vector<2x16xf32>
    %485 = math.tanh %484 : vector<2x16xf32>
    %cst_193 = arith.constant 1.000000e+00 : f32
    %486 = vector.broadcast %cst_193 : f32 to vector<2x16xf32>
    %487 = arith.addf %485, %486 : vector<2x16xf32>
    %cst_194 = arith.constant 5.000000e-01 : f32
    %488 = vector.broadcast %cst_194 : f32 to vector<2x16xf32>
    %489 = arith.mulf %488, %487 : vector<2x16xf32>
    %490 = vector.extract_strided_slice %473 {offsets = [0, 32], sizes = [2, 16], strides = [1, 1]} : vector<2x64xf32> to vector<2x16xf32>
    %491 = math.tanh %490 : vector<2x16xf32>
    %492 = vector.extract_strided_slice %473 {offsets = [0, 48], sizes = [2, 16], strides = [1, 1]} : vector<2x64xf32> to vector<2x16xf32>
    %cst_195 = arith.constant 5.000000e-01 : f32
    %493 = vector.broadcast %cst_195 : f32 to vector<2x16xf32>
    %494 = arith.mulf %493, %492 : vector<2x16xf32>
    %495 = math.tanh %494 : vector<2x16xf32>
    %cst_196 = arith.constant 1.000000e+00 : f32
    %496 = vector.broadcast %cst_196 : f32 to vector<2x16xf32>
    %497 = arith.addf %495, %496 : vector<2x16xf32>
    %cst_197 = arith.constant 5.000000e-01 : f32
    %498 = vector.broadcast %cst_197 : f32 to vector<2x16xf32>
    %499 = arith.mulf %498, %497 : vector<2x16xf32>
    %500 = arith.mulf %489, %417 : vector<2x16xf32>
    %501 = arith.mulf %481, %491 : vector<2x16xf32>
    %502 = arith.addf %500, %501 : vector<2x16xf32>
    %503 = math.tanh %502 : vector<2x16xf32>
    %504 = arith.mulf %499, %503 : vector<2x16xf32>
    %505 = arith.truncf %453 : vector<2x16xf32> to vector<2x16xbf16>
    %cst_198 = arith.constant dense<0.000000e+00> : vector<2x64xf32>
    %506 = tpu.matmul %505, %28, %cst_198 {dimension_numbers = #tpu.dot_dimension_numbers<[1], [0], [0], [1], [0, 0, 1, 1], [], []>} : vector<2x16xbf16>, vector<16x64xbf16>, vector<2x64xf32> -> vector<2x64xf32>
    %507 = arith.addf %470, %506 : vector<2x64xf32>
    %508 = vector.extract_strided_slice %507 {offsets = [0, 0], sizes = [2, 16], strides = [1, 1]} : vector<2x64xf32> to vector<2x16xf32>
    %cst_199 = arith.constant 5.000000e-01 : f32
    %509 = vector.broadcast %cst_199 : f32 to vector<2x16xf32>
    %510 = arith.mulf %509, %508 : vector<2x16xf32>
    %511 = math.tanh %510 : vector<2x16xf32>
    %cst_200 = arith.constant 1.000000e+00 : f32
    %512 = vector.broadcast %cst_200 : f32 to vector<2x16xf32>
    %513 = arith.addf %511, %512 : vector<2x16xf32>
    %cst_201 = arith.constant 5.000000e-01 : f32
    %514 = vector.broadcast %cst_201 : f32 to vector<2x16xf32>
    %515 = arith.mulf %514, %513 : vector<2x16xf32>
    %516 = vector.extract_strided_slice %507 {offsets = [0, 16], sizes = [2, 16], strides = [1, 1]} : vector<2x64xf32> to vector<2x16xf32>
    %cst_202 = arith.constant 5.000000e-01 : f32
    %517 = vector.broadcast %cst_202 : f32 to vector<2x16xf32>
    %518 = arith.mulf %517, %516 : vector<2x16xf32>
    %519 = math.tanh %518 : vector<2x16xf32>
    %cst_203 = arith.constant 1.000000e+00 : f32
    %520 = vector.broadcast %cst_203 : f32 to vector<2x16xf32>
    %521 = arith.addf %519, %520 : vector<2x16xf32>
    %cst_204 = arith.constant 5.000000e-01 : f32
    %522 = vector.broadcast %cst_204 : f32 to vector<2x16xf32>
    %523 = arith.mulf %522, %521 : vector<2x16xf32>
    %524 = vector.extract_strided_slice %507 {offsets = [0, 32], sizes = [2, 16], strides = [1, 1]} : vector<2x64xf32> to vector<2x16xf32>
    %525 = math.tanh %524 : vector<2x16xf32>
    %526 = vector.extract_strided_slice %507 {offsets = [0, 48], sizes = [2, 16], strides = [1, 1]} : vector<2x64xf32> to vector<2x16xf32>
    %cst_205 = arith.constant 5.000000e-01 : f32
    %527 = vector.broadcast %cst_205 : f32 to vector<2x16xf32>
    %528 = arith.mulf %527, %526 : vector<2x16xf32>
    %529 = math.tanh %528 : vector<2x16xf32>
    %cst_206 = arith.constant 1.000000e+00 : f32
    %530 = vector.broadcast %cst_206 : f32 to vector<2x16xf32>
    %531 = arith.addf %529, %530 : vector<2x16xf32>
    %cst_207 = arith.constant 5.000000e-01 : f32
    %532 = vector.broadcast %cst_207 : f32 to vector<2x16xf32>
    %533 = arith.mulf %532, %531 : vector<2x16xf32>
    %534 = arith.mulf %523, %451 : vector<2x16xf32>
    %535 = arith.mulf %515, %525 : vector<2x16xf32>
    %536 = arith.addf %534, %535 : vector<2x16xf32>
    %537 = math.tanh %536 : vector<2x16xf32>
    %538 = arith.mulf %533, %537 : vector<2x16xf32>
    %c0_208 = arith.constant 0 : index
    %539 = arith.index_cast %464 : i32 to index
    %c0_209 = arith.constant 0 : index
    %540 = vector.load %arg6[%c0_208, %539, %c0_209] : memref<1x16x16xf32, #tpu.memory_space<vmem>>, vector<1x2x16xf32>
    %541 = vector.shape_cast %540 : vector<1x2x16xf32> to vector<2x16xf32>
    %542 = vector.shape_cast %504 : vector<2x16xf32> to vector<1x2x16xf32>
    tpu.vector_store %arg6[%c0_208, %539, %c0_209], %542 {strides = array<i32>} : memref<1x16x16xf32, #tpu.memory_space<vmem>>, vector<1x2x16xf32>,
    %c0_210 = arith.constant 0 : index
    %543 = arith.index_cast %466 : i32 to index
    %c0_211 = arith.constant 0 : index
    %544 = vector.load %arg7[%c0_210, %543, %c0_211] : memref<1x16x16xf32, #tpu.memory_space<vmem>>, vector<1x2x16xf32>
    %545 = vector.shape_cast %544 : vector<1x2x16xf32> to vector<2x16xf32>
    %546 = vector.shape_cast %538 : vector<2x16xf32> to vector<1x2x16xf32>
    tpu.vector_store %arg7[%c0_210, %543, %c0_211], %546 {strides = array<i32>} : memref<1x16x16xf32, #tpu.memory_space<vmem>>, vector<1x2x16xf32>,
    %c6_i32 = arith.constant 6 : i32
    %c7_i32_212 = arith.constant 7 : i32
    %547 = arith.subi %c7_i32_212, %c6_i32 : i32
    %c2_i32_213 = arith.constant 2 : i32
    %548 = arith.muli %c6_i32, %c2_i32_213 : i32
    %549 = tpu.assume_multiple %548, 2 : i32
    %c2_i32_214 = arith.constant 2 : i32
    %550 = arith.muli %547, %c2_i32_214 : i32
    %551 = tpu.assume_multiple %550, 2 : i32
    %552 = arith.index_cast %549 : i32 to index
    %c0_215 = arith.constant 0 : index
    %553 = vector.load %arg10[%552, %c0_215] : memref<16x64xf32, #tpu.memory_space<vmem>>, vector<2x64xf32>
    %554 = arith.index_cast %551 : i32 to index
    %c0_216 = arith.constant 0 : index
    %555 = vector.load %arg11[%554, %c0_216] : memref<16x64xf32, #tpu.memory_space<vmem>>, vector<2x64xf32>
    %556 = arith.truncf %504 : vector<2x16xf32> to vector<2x16xbf16>
    %cst_217 = arith.constant dense<0.000000e+00> : vector<2x64xf32>
    %557 = tpu.matmul %556, %26, %cst_217 {dimension_numbers = #tpu.dot_dimension_numbers<[1], [0], [0], [1], [0, 0, 1, 1], [], []>} : vector<2x16xbf16>, vector<16x64xbf16>, vector<2x64xf32> -> vector<2x64xf32>
    %558 = arith.addf %553, %557 : vector<2x64xf32>
    %559 = vector.extract_strided_slice %558 {offsets = [0, 0], sizes = [2, 16], strides = [1, 1]} : vector<2x64xf32> to vector<2x16xf32>
    %cst_218 = arith.constant 5.000000e-01 : f32
    %560 = vector.broadcast %cst_218 : f32 to vector<2x16xf32>
    %561 = arith.mulf %560, %559 : vector<2x16xf32>
    %562 = math.tanh %561 : vector<2x16xf32>
    %cst_219 = arith.constant 1.000000e+00 : f32
    %563 = vector.broadcast %cst_219 : f32 to vector<2x16xf32>
    %564 = arith.addf %562, %563 : vector<2x16xf32>
    %cst_220 = arith.constant 5.000000e-01 : f32
    %565 = vector.broadcast %cst_220 : f32 to vector<2x16xf32>
    %566 = arith.mulf %565, %564 : vector<2x16xf32>
    %567 = vector.extract_strided_slice %558 {offsets = [0, 16], sizes = [2, 16], strides = [1, 1]} : vector<2x64xf32> to vector<2x16xf32>
    %cst_221 = arith.constant 5.000000e-01 : f32
    %568 = vector.broadcast %cst_221 : f32 to vector<2x16xf32>
    %569 = arith.mulf %568, %567 : vector<2x16xf32>
    %570 = math.tanh %569 : vector<2x16xf32>
    %cst_222 = arith.constant 1.000000e+00 : f32
    %571 = vector.broadcast %cst_222 : f32 to vector<2x16xf32>
    %572 = arith.addf %570, %571 : vector<2x16xf32>
    %cst_223 = arith.constant 5.000000e-01 : f32
    %573 = vector.broadcast %cst_223 : f32 to vector<2x16xf32>
    %574 = arith.mulf %573, %572 : vector<2x16xf32>
    %575 = vector.extract_strided_slice %558 {offsets = [0, 32], sizes = [2, 16], strides = [1, 1]} : vector<2x64xf32> to vector<2x16xf32>
    %576 = math.tanh %575 : vector<2x16xf32>
    %577 = vector.extract_strided_slice %558 {offsets = [0, 48], sizes = [2, 16], strides = [1, 1]} : vector<2x64xf32> to vector<2x16xf32>
    %cst_224 = arith.constant 5.000000e-01 : f32
    %578 = vector.broadcast %cst_224 : f32 to vector<2x16xf32>
    %579 = arith.mulf %578, %577 : vector<2x16xf32>
    %580 = math.tanh %579 : vector<2x16xf32>
    %cst_225 = arith.constant 1.000000e+00 : f32
    %581 = vector.broadcast %cst_225 : f32 to vector<2x16xf32>
    %582 = arith.addf %580, %581 : vector<2x16xf32>
    %cst_226 = arith.constant 5.000000e-01 : f32
    %583 = vector.broadcast %cst_226 : f32 to vector<2x16xf32>
    %584 = arith.mulf %583, %582 : vector<2x16xf32>
    %585 = arith.mulf %574, %502 : vector<2x16xf32>
    %586 = arith.mulf %566, %576 : vector<2x16xf32>
    %587 = arith.addf %585, %586 : vector<2x16xf32>
    %588 = math.tanh %587 : vector<2x16xf32>
    %589 = arith.mulf %584, %588 : vector<2x16xf32>
    %590 = arith.truncf %538 : vector<2x16xf32> to vector<2x16xbf16>
    %cst_227 = arith.constant dense<0.000000e+00> : vector<2x64xf32>
    %591 = tpu.matmul %590, %28, %cst_227 {dimension_numbers = #tpu.dot_dimension_numbers<[1], [0], [0], [1], [0, 0, 1, 1], [], []>} : vector<2x16xbf16>, vector<16x64xbf16>, vector<2x64xf32> -> vector<2x64xf32>
    %592 = arith.addf %555, %591 : vector<2x64xf32>
    %593 = vector.extract_strided_slice %592 {offsets = [0, 0], sizes = [2, 16], strides = [1, 1]} : vector<2x64xf32> to vector<2x16xf32>
    %cst_228 = arith.constant 5.000000e-01 : f32
    %594 = vector.broadcast %cst_228 : f32 to vector<2x16xf32>
    %595 = arith.mulf %594, %593 : vector<2x16xf32>
    %596 = math.tanh %595 : vector<2x16xf32>
    %cst_229 = arith.constant 1.000000e+00 : f32
    %597 = vector.broadcast %cst_229 : f32 to vector<2x16xf32>
    %598 = arith.addf %596, %597 : vector<2x16xf32>
    %cst_230 = arith.constant 5.000000e-01 : f32
    %599 = vector.broadcast %cst_230 : f32 to vector<2x16xf32>
    %600 = arith.mulf %599, %598 : vector<2x16xf32>
    %601 = vector.extract_strided_slice %592 {offsets = [0, 16], sizes = [2, 16], strides = [1, 1]} : vector<2x64xf32> to vector<2x16xf32>
    %cst_231 = arith.constant 5.000000e-01 : f32
    %602 = vector.broadcast %cst_231 : f32 to vector<2x16xf32>
    %603 = arith.mulf %602, %601 : vector<2x16xf32>
    %604 = math.tanh %603 : vector<2x16xf32>
    %cst_232 = arith.constant 1.000000e+00 : f32
    %605 = vector.broadcast %cst_232 : f32 to vector<2x16xf32>
    %606 = arith.addf %604, %605 : vector<2x16xf32>
    %cst_233 = arith.constant 5.000000e-01 : f32
    %607 = vector.broadcast %cst_233 : f32 to vector<2x16xf32>
    %608 = arith.mulf %607, %606 : vector<2x16xf32>
    %609 = vector.extract_strided_slice %592 {offsets = [0, 32], sizes = [2, 16], strides = [1, 1]} : vector<2x64xf32> to vector<2x16xf32>
    %610 = math.tanh %609 : vector<2x16xf32>
    %611 = vector.extract_strided_slice %592 {offsets = [0, 48], sizes = [2, 16], strides = [1, 1]} : vector<2x64xf32> to vector<2x16xf32>
    %cst_234 = arith.constant 5.000000e-01 : f32
    %612 = vector.broadcast %cst_234 : f32 to vector<2x16xf32>
    %613 = arith.mulf %612, %611 : vector<2x16xf32>
    %614 = math.tanh %613 : vector<2x16xf32>
    %cst_235 = arith.constant 1.000000e+00 : f32
    %615 = vector.broadcast %cst_235 : f32 to vector<2x16xf32>
    %616 = arith.addf %614, %615 : vector<2x16xf32>
    %cst_236 = arith.constant 5.000000e-01 : f32
    %617 = vector.broadcast %cst_236 : f32 to vector<2x16xf32>
    %618 = arith.mulf %617, %616 : vector<2x16xf32>
    %619 = arith.mulf %608, %536 : vector<2x16xf32>
    %620 = arith.mulf %600, %610 : vector<2x16xf32>
    %621 = arith.addf %619, %620 : vector<2x16xf32>
    %622 = math.tanh %621 : vector<2x16xf32>
    %623 = arith.mulf %618, %622 : vector<2x16xf32>
    %c0_237 = arith.constant 0 : index
    %624 = arith.index_cast %549 : i32 to index
    %c0_238 = arith.constant 0 : index
    %625 = vector.load %arg6[%c0_237, %624, %c0_238] : memref<1x16x16xf32, #tpu.memory_space<vmem>>, vector<1x2x16xf32>
    %626 = vector.shape_cast %625 : vector<1x2x16xf32> to vector<2x16xf32>
    %627 = vector.shape_cast %589 : vector<2x16xf32> to vector<1x2x16xf32>
    tpu.vector_store %arg6[%c0_237, %624, %c0_238], %627 {strides = array<i32>} : memref<1x16x16xf32, #tpu.memory_space<vmem>>, vector<1x2x16xf32>,
    %c0_239 = arith.constant 0 : index
    %628 = arith.index_cast %551 : i32 to index
    %c0_240 = arith.constant 0 : index
    %629 = vector.load %arg7[%c0_239, %628, %c0_240] : memref<1x16x16xf32, #tpu.memory_space<vmem>>, vector<1x2x16xf32>
    %630 = vector.shape_cast %629 : vector<1x2x16xf32> to vector<2x16xf32>
    %631 = vector.shape_cast %623 : vector<2x16xf32> to vector<1x2x16xf32>
    tpu.vector_store %arg7[%c0_239, %628, %c0_240], %631 {strides = array<i32>} : memref<1x16x16xf32, #tpu.memory_space<vmem>>, vector<1x2x16xf32>,
    %c7_i32_241 = arith.constant 7 : i32
    %c7_i32_242 = arith.constant 7 : i32
    %632 = arith.subi %c7_i32_242, %c7_i32_241 : i32
    %c2_i32_243 = arith.constant 2 : i32
    %633 = arith.muli %c7_i32_241, %c2_i32_243 : i32
    %634 = tpu.assume_multiple %633, 2 : i32
    %c2_i32_244 = arith.constant 2 : i32
    %635 = arith.muli %632, %c2_i32_244 : i32
    %636 = tpu.assume_multiple %635, 2 : i32
    %637 = arith.index_cast %634 : i32 to index
    %c0_245 = arith.constant 0 : index
    %638 = vector.load %arg10[%637, %c0_245] : memref<16x64xf32, #tpu.memory_space<vmem>>, vector<2x64xf32>
    %639 = arith.index_cast %636 : i32 to index
    %c0_246 = arith.constant 0 : index
    %640 = vector.load %arg11[%639, %c0_246] : memref<16x64xf32, #tpu.memory_space<vmem>>, vector<2x64xf32>
    %641 = arith.truncf %589 : vector<2x16xf32> to vector<2x16xbf16>
    %cst_247 = arith.constant dense<0.000000e+00> : vector<2x64xf32>
    %642 = tpu.matmul %641, %26, %cst_247 {dimension_numbers = #tpu.dot_dimension_numbers<[1], [0], [0], [1], [0, 0, 1, 1], [], []>} : vector<2x16xbf16>, vector<16x64xbf16>, vector<2x64xf32> -> vector<2x64xf32>
    %643 = arith.addf %638, %642 : vector<2x64xf32>
    %644 = vector.extract_strided_slice %643 {offsets = [0, 0], sizes = [2, 16], strides = [1, 1]} : vector<2x64xf32> to vector<2x16xf32>
    %cst_248 = arith.constant 5.000000e-01 : f32
    %645 = vector.broadcast %cst_248 : f32 to vector<2x16xf32>
    %646 = arith.mulf %645, %644 : vector<2x16xf32>
    %647 = math.tanh %646 : vector<2x16xf32>
    %cst_249 = arith.constant 1.000000e+00 : f32
    %648 = vector.broadcast %cst_249 : f32 to vector<2x16xf32>
    %649 = arith.addf %647, %648 : vector<2x16xf32>
    %cst_250 = arith.constant 5.000000e-01 : f32
    %650 = vector.broadcast %cst_250 : f32 to vector<2x16xf32>
    %651 = arith.mulf %650, %649 : vector<2x16xf32>
    %652 = vector.extract_strided_slice %643 {offsets = [0, 16], sizes = [2, 16], strides = [1, 1]} : vector<2x64xf32> to vector<2x16xf32>
    %cst_251 = arith.constant 5.000000e-01 : f32
    %653 = vector.broadcast %cst_251 : f32 to vector<2x16xf32>
    %654 = arith.mulf %653, %652 : vector<2x16xf32>
    %655 = math.tanh %654 : vector<2x16xf32>
    %cst_252 = arith.constant 1.000000e+00 : f32
    %656 = vector.broadcast %cst_252 : f32 to vector<2x16xf32>
    %657 = arith.addf %655, %656 : vector<2x16xf32>
    %cst_253 = arith.constant 5.000000e-01 : f32
    %658 = vector.broadcast %cst_253 : f32 to vector<2x16xf32>
    %659 = arith.mulf %658, %657 : vector<2x16xf32>
    %660 = vector.extract_strided_slice %643 {offsets = [0, 32], sizes = [2, 16], strides = [1, 1]} : vector<2x64xf32> to vector<2x16xf32>
    %661 = math.tanh %660 : vector<2x16xf32>
    %662 = vector.extract_strided_slice %643 {offsets = [0, 48], sizes = [2, 16], strides = [1, 1]} : vector<2x64xf32> to vector<2x16xf32>
    %cst_254 = arith.constant 5.000000e-01 : f32
    %663 = vector.broadcast %cst_254 : f32 to vector<2x16xf32>
    %664 = arith.mulf %663, %662 : vector<2x16xf32>
    %665 = math.tanh %664 : vector<2x16xf32>
    %cst_255 = arith.constant 1.000000e+00 : f32
    %666 = vector.broadcast %cst_255 : f32 to vector<2x16xf32>
    %667 = arith.addf %665, %666 : vector<2x16xf32>
    %cst_256 = arith.constant 5.000000e-01 : f32
    %668 = vector.broadcast %cst_256 : f32 to vector<2x16xf32>
    %669 = arith.mulf %668, %667 : vector<2x16xf32>
    %670 = arith.mulf %659, %587 : vector<2x16xf32>
    %671 = arith.mulf %651, %661 : vector<2x16xf32>
    %672 = arith.addf %670, %671 : vector<2x16xf32>
    %673 = math.tanh %672 : vector<2x16xf32>
    %674 = arith.mulf %669, %673 : vector<2x16xf32>
    %675 = arith.truncf %623 : vector<2x16xf32> to vector<2x16xbf16>
    %cst_257 = arith.constant dense<0.000000e+00> : vector<2x64xf32>
    %676 = tpu.matmul %675, %28, %cst_257 {dimension_numbers = #tpu.dot_dimension_numbers<[1], [0], [0], [1], [0, 0, 1, 1], [], []>} : vector<2x16xbf16>, vector<16x64xbf16>, vector<2x64xf32> -> vector<2x64xf32>
    %677 = arith.addf %640, %676 : vector<2x64xf32>
    %678 = vector.extract_strided_slice %677 {offsets = [0, 0], sizes = [2, 16], strides = [1, 1]} : vector<2x64xf32> to vector<2x16xf32>
    %cst_258 = arith.constant 5.000000e-01 : f32
    %679 = vector.broadcast %cst_258 : f32 to vector<2x16xf32>
    %680 = arith.mulf %679, %678 : vector<2x16xf32>
    %681 = math.tanh %680 : vector<2x16xf32>
    %cst_259 = arith.constant 1.000000e+00 : f32
    %682 = vector.broadcast %cst_259 : f32 to vector<2x16xf32>
    %683 = arith.addf %681, %682 : vector<2x16xf32>
    %cst_260 = arith.constant 5.000000e-01 : f32
    %684 = vector.broadcast %cst_260 : f32 to vector<2x16xf32>
    %685 = arith.mulf %684, %683 : vector<2x16xf32>
    %686 = vector.extract_strided_slice %677 {offsets = [0, 16], sizes = [2, 16], strides = [1, 1]} : vector<2x64xf32> to vector<2x16xf32>
    %cst_261 = arith.constant 5.000000e-01 : f32
    %687 = vector.broadcast %cst_261 : f32 to vector<2x16xf32>
    %688 = arith.mulf %687, %686 : vector<2x16xf32>
    %689 = math.tanh %688 : vector<2x16xf32>
    %cst_262 = arith.constant 1.000000e+00 : f32
    %690 = vector.broadcast %cst_262 : f32 to vector<2x16xf32>
    %691 = arith.addf %689, %690 : vector<2x16xf32>
    %cst_263 = arith.constant 5.000000e-01 : f32
    %692 = vector.broadcast %cst_263 : f32 to vector<2x16xf32>
    %693 = arith.mulf %692, %691 : vector<2x16xf32>
    %694 = vector.extract_strided_slice %677 {offsets = [0, 32], sizes = [2, 16], strides = [1, 1]} : vector<2x64xf32> to vector<2x16xf32>
    %695 = math.tanh %694 : vector<2x16xf32>
    %696 = vector.extract_strided_slice %677 {offsets = [0, 48], sizes = [2, 16], strides = [1, 1]} : vector<2x64xf32> to vector<2x16xf32>
    %cst_264 = arith.constant 5.000000e-01 : f32
    %697 = vector.broadcast %cst_264 : f32 to vector<2x16xf32>
    %698 = arith.mulf %697, %696 : vector<2x16xf32>
    %699 = math.tanh %698 : vector<2x16xf32>
    %cst_265 = arith.constant 1.000000e+00 : f32
    %700 = vector.broadcast %cst_265 : f32 to vector<2x16xf32>
    %701 = arith.addf %699, %700 : vector<2x16xf32>
    %cst_266 = arith.constant 5.000000e-01 : f32
    %702 = vector.broadcast %cst_266 : f32 to vector<2x16xf32>
    %703 = arith.mulf %702, %701 : vector<2x16xf32>
    %704 = arith.mulf %693, %621 : vector<2x16xf32>
    %705 = arith.mulf %685, %695 : vector<2x16xf32>
    %706 = arith.addf %704, %705 : vector<2x16xf32>
    %707 = math.tanh %706 : vector<2x16xf32>
    %708 = arith.mulf %703, %707 : vector<2x16xf32>
    %c0_267 = arith.constant 0 : index
    %709 = arith.index_cast %634 : i32 to index
    %c0_268 = arith.constant 0 : index
    %710 = vector.load %arg6[%c0_267, %709, %c0_268] : memref<1x16x16xf32, #tpu.memory_space<vmem>>, vector<1x2x16xf32>
    %711 = vector.shape_cast %710 : vector<1x2x16xf32> to vector<2x16xf32>
    %712 = vector.shape_cast %674 : vector<2x16xf32> to vector<1x2x16xf32>
    tpu.vector_store %arg6[%c0_267, %709, %c0_268], %712 {strides = array<i32>} : memref<1x16x16xf32, #tpu.memory_space<vmem>>, vector<1x2x16xf32>,
    %c0_269 = arith.constant 0 : index
    %713 = arith.index_cast %636 : i32 to index
    %c0_270 = arith.constant 0 : index
    %714 = vector.load %arg7[%c0_269, %713, %c0_270] : memref<1x16x16xf32, #tpu.memory_space<vmem>>, vector<1x2x16xf32>
    %715 = vector.shape_cast %714 : vector<1x2x16xf32> to vector<2x16xf32>
    %716 = vector.shape_cast %708 : vector<2x16xf32> to vector<1x2x16xf32>
    tpu.vector_store %arg7[%c0_269, %713, %c0_270], %716 {strides = array<i32>} : memref<1x16x16xf32, #tpu.memory_space<vmem>>, vector<1x2x16xf32>,
    %c8_i32 = arith.constant 8 : i32
    %c0_271 = arith.constant 0 : index
    %c0_272 = arith.constant 0 : index
    %c0_273 = arith.constant 0 : index
    %717 = vector.load %arg12[%c0_271, %c0_272, %c0_273] : memref<2x2x16xf32, #tpu.memory_space<vmem>>, vector<1x2x16xf32>
    %718 = vector.shape_cast %717 : vector<1x2x16xf32> to vector<2x16xf32>
    %719 = vector.shape_cast %674 : vector<2x16xf32> to vector<1x2x16xf32>
    tpu.vector_store %arg12[%c0_271, %c0_272, %c0_273], %719 {strides = array<i32>} : memref<2x2x16xf32, #tpu.memory_space<vmem>>, vector<1x2x16xf32>,
    %c0_274 = arith.constant 0 : index
    %c0_275 = arith.constant 0 : index
    %c0_276 = arith.constant 0 : index
    %720 = vector.load %arg13[%c0_274, %c0_275, %c0_276] : memref<2x2x16xf32, #tpu.memory_space<vmem>>, vector<1x2x16xf32>
    %721 = vector.shape_cast %720 : vector<1x2x16xf32> to vector<2x16xf32>
    %722 = vector.shape_cast %672 : vector<2x16xf32> to vector<1x2x16xf32>
    tpu.vector_store %arg13[%c0_274, %c0_275, %c0_276], %722 {strides = array<i32>} : memref<2x2x16xf32, #tpu.memory_space<vmem>>, vector<1x2x16xf32>,
    %c1_277 = arith.constant 1 : index
    %c0_278 = arith.constant 0 : index
    %c0_279 = arith.constant 0 : index
    %723 = vector.load %arg12[%c1_277, %c0_278, %c0_279] : memref<2x2x16xf32, #tpu.memory_space<vmem>>, vector<1x2x16xf32>
    %724 = vector.shape_cast %723 : vector<1x2x16xf32> to vector<2x16xf32>
    %725 = vector.shape_cast %708 : vector<2x16xf32> to vector<1x2x16xf32>
    tpu.vector_store %arg12[%c1_277, %c0_278, %c0_279], %725 {strides = array<i32>} : memref<2x2x16xf32, #tpu.memory_space<vmem>>, vector<1x2x16xf32>,
    %c1_280 = arith.constant 1 : index
    %c0_281 = arith.constant 0 : index
    %c0_282 = arith.constant 0 : index
    %726 = vector.load %arg13[%c1_280, %c0_281, %c0_282] : memref<2x2x16xf32, #tpu.memory_space<vmem>>, vector<1x2x16xf32>
    %727 = vector.shape_cast %726 : vector<1x2x16xf32> to vector<2x16xf32>
    %728 = vector.shape_cast %706 : vector<2x16xf32> to vector<1x2x16xf32>
    tpu.vector_store %arg13[%c1_280, %c0_281, %c0_282], %728 {strides = array<i32>} : memref<2x2x16xf32, #tpu.memory_space<vmem>>, vector<1x2x16xf32>,
    %c0_283 = arith.constant 0 : index
    %c0_284 = arith.constant 0 : index
    %c0_285 = arith.constant 0 : index
    %729 = vector.load %arg8[%c0_283, %c0_284, %c0_285] : memref<2x2x16xf32, #tpu.memory_space<vmem>>, vector<1x2x16xf32>
    %730 = vector.shape_cast %729 : vector<1x2x16xf32> to vector<2x16xf32>
    %731 = vector.shape_cast %674 : vector<2x16xf32> to vector<1x2x16xf32>
    tpu.vector_store %arg8[%c0_283, %c0_284, %c0_285], %731 {strides = array<i32>} : memref<2x2x16xf32, #tpu.memory_space<vmem>>, vector<1x2x16xf32>,
    %c1_286 = arith.constant 1 : index
    %c0_287 = arith.constant 0 : index
    %c0_288 = arith.constant 0 : index
    %732 = vector.load %arg8[%c1_286, %c0_287, %c0_288] : memref<2x2x16xf32, #tpu.memory_space<vmem>>, vector<1x2x16xf32>
    %733 = vector.shape_cast %732 : vector<1x2x16xf32> to vector<2x16xf32>
    %734 = vector.shape_cast %708 : vector<2x16xf32> to vector<1x2x16xf32>
    tpu.vector_store %arg8[%c1_286, %c0_287, %c0_288], %734 {strides = array<i32>} : memref<2x2x16xf32, #tpu.memory_space<vmem>>, vector<1x2x16xf32>,
    %c0_289 = arith.constant 0 : index
    %c0_290 = arith.constant 0 : index
    %c0_291 = arith.constant 0 : index
    %735 = vector.load %arg9[%c0_289, %c0_290, %c0_291] : memref<2x2x16xf32, #tpu.memory_space<vmem>>, vector<1x2x16xf32>
    %736 = vector.shape_cast %735 : vector<1x2x16xf32> to vector<2x16xf32>
    %737 = vector.shape_cast %672 : vector<2x16xf32> to vector<1x2x16xf32>
    tpu.vector_store %arg9[%c0_289, %c0_290, %c0_291], %737 {strides = array<i32>} : memref<2x2x16xf32, #tpu.memory_space<vmem>>, vector<1x2x16xf32>,
    %c1_292 = arith.constant 1 : index
    %c0_293 = arith.constant 0 : index
    %c0_294 = arith.constant 0 : index
    %738 = vector.load %arg9[%c1_292, %c0_293, %c0_294] : memref<2x2x16xf32, #tpu.memory_space<vmem>>, vector<1x2x16xf32>
    %739 = vector.shape_cast %738 : vector<1x2x16xf32> to vector<2x16xf32>
    %740 = vector.shape_cast %706 : vector<2x16xf32> to vector<1x2x16xf32>
    tpu.vector_store %arg9[%c1_292, %c0_293, %c0_294], %740 {strides = array<i32>} : memref<2x2x16xf32, #tpu.memory_space<vmem>>, vector<1x2x16xf32>,
    return
  }
  func.func @transform_0(%arg0: i32) -> (i32, i32, i32) {
    %c0_i32 = arith.constant 0 : i32
    %c0_i32_0 = arith.constant 0 : i32
    %c0_i32_1 = arith.constant 0 : i32
    return %arg0, %c0_i32, %c0_i32_0 : i32, i32, i32
  }
  func.func @transform_1(%arg0: i32) -> (i32, i32, i32) {
    %c0_i32 = arith.constant 0 : i32
    %0 = arith.subi %c0_i32, %arg0 : i32
    %c0_i32_0 = arith.constant 0 : i32
    %c0_i32_1 = arith.constant 0 : i32
    %c0_i32_2 = arith.constant 0 : i32
    return %0, %c0_i32_0, %c0_i32_1 : i32, i32, i32
  }
  func.func @transform_2(%arg0: i32) -> (i32, i32, i32) {
    %c0_i32 = arith.constant 0 : i32
    %c0_i32_0 = arith.constant 0 : i32
    %c0_i32_1 = arith.constant 0 : i32
    %c0_i32_2 = arith.constant 0 : i32
    return %c0_i32, %c0_i32_0, %c0_i32_1 : i32, i32, i32
  }
  func.func @transform_3(%arg0: i32) -> (i32, i32, i32) {
    %c0_i32 = arith.constant 0 : i32
    %c0_i32_0 = arith.constant 0 : i32
    %c0_i32_1 = arith.constant 0 : i32
    %c0_i32_2 = arith.constant 0 : i32
    return %c0_i32, %c0_i32_0, %c0_i32_1 : i32, i32, i32
  }
  func.func @transform_4(%arg0: i32) -> (i32, i32) {
    %c0_i32 = arith.constant 0 : i32
    %c0_i32_0 = arith.constant 0 : i32
    %c0_i32_1 = arith.constant 0 : i32
    return %c0_i32, %c0_i32_0 : i32, i32
  }
  func.func @transform_5(%arg0: i32) -> (i32, i32, i32) {
    %c0_i32 = arith.constant 0 : i32
    %c0_i32_0 = arith.constant 0 : i32
    %c0_i32_1 = arith.constant 0 : i32
    return %arg0, %c0_i32, %c0_i32_0 : i32, i32, i32
  }
  func.func @transform_6(%arg0: i32) -> (i32, i32, i32) {
    %c0_i32 = arith.constant 0 : i32
    %0 = arith.subi %c0_i32, %arg0 : i32
    %c0_i32_0 = arith.constant 0 : i32
    %c0_i32_1 = arith.constant 0 : i32
    %c0_i32_2 = arith.constant 0 : i32
    return %0, %c0_i32_0, %c0_i32_1 : i32, i32, i32
  }
  func.func @transform_7(%arg0: i32) -> (i32, i32, i32) {
    %c0_i32 = arith.constant 0 : i32
    %c0_i32_0 = arith.constant 0 : i32
    %c0_i32_1 = arith.constant 0 : i32
    %c0_i32_2 = arith.constant 0 : i32
    return %c0_i32, %c0_i32_0, %c0_i32_1 : i32, i32, i32
  }
  func.func @transform_8(%arg0: i32) -> (i32, i32, i32) {
    %c0_i32 = arith.constant 0 : i32
    %c0_i32_0 = arith.constant 0 : i32
    %c0_i32_1 = arith.constant 0 : i32
    %c0_i32_2 = arith.constant 0 : i32
    return %c0_i32, %c0_i32_0, %c0_i32_1 : i32, i32, i32
  }
}

</mosaic_0001>

<bundles_post_ra>
// kernel: tpu_custom_call.1
= control target key start
LH: loop header
LB: loop body
LE: loop exit
PB: predicated region body
PF: predicated region fallthrough
CT: control target
= control target key end

     0   :  { %14 = vsyncpa [#allocation7], 0  ;;  %s2567_s0 = inlined_call_operand.hbm [shape: bf16[1,16,16], index: 0, kind: input, shape index: {}]   ;;  %s2568_s1 = inlined_call_operand.hbm [shape: bf16[1,16,16], index: 1, kind: input, shape index: {}]   ;;  %s2569_s2 = inlined_call_operand.hbm [shape: bf16[2,16,64], index: 2, kind: input, shape index: {}]   ;;  %s2570_s3 = inlined_call_operand.hbm [shape: bf16[2,16,64], index: 3, kind: input, shape index: {}]   ;;  %s2571_s4 = inlined_call_operand.vmem [shape: f32[2,64], index: 4, kind: input, shape index: {}]   ;;  %s2572_s5 = inlined_call_operand.hbm [shape: f32[1,16,16], index: 5, kind: output, shape index: {0}]   ;;  %s2573_s6 = inlined_call_operand.hbm [shape: f32[1,16,16], index: 6, kind: output, shape index: {1}]   ;;  %s2574_s7 = inlined_call_operand.hbm [shape: f32[2,2,16], index: 7, kind: output, shape index: {2}]   ;;  %s2575_s8 = inlined_call_operand.hbm [shape: f32[2,2,16], index: 8, kind: output, shape index: {3}]  }
   0x1   :  { %15 = vsyncpa [#allocation10], 0 }
   0x2   :  { %16 = vsyncpa [#allocation13], 0 }
   0x3   :  { %17 = vsyncpa [#allocation8], 0 }
   0x4   :  { %18 = vsyncpa [#allocation16], 0 }
   0x5   :  { %19 = vsyncpa [#allocation19], 0  ;;  %s2075_s27 = smov [#allocation9]   ;;  %s2076_s29 = smov [#allocation6]  }
   0x6   :  { %s41_s28 = sshll.u32 %s2075_s27, 4  ;;  %s25_s30 = sshll.u32 %s2076_s29, 4  ;;  %s42_s28 = int_to_ptr.vmem [resolvable:$true] %s41_s28  ;;  %s2140_s30 = int_to_ptr.vmem [resolvable:$true] %s25_s30 }
   0x7   :  { %s1887_s11 = scalar_lea.hbm %s2568_s1, 128 }
   0x8   :  { %p1888_p0 = scmp.ne.s32.totalorder %s2568_s1, %s1887_s11  ;;  %p1891_p1 = scmp.lt.u32.totalorder %s1887_s11, %s2568_s1 }
   0xa   :  { %p1893_p2 = pnand %p1891_p1, %p1888_p0 }
   0xc   :  { %1896 = shalt.err (!%p1893_p2)
}
   0xd   :  { %s1897_s16 = scalar_lea.vmem %s42_s28, 128  ;;  %p1902_p4 = scmp.lt.s32.totalorder %s42_s28, %s42_s28 }
   0xe   :  { %p1898_p3 = scmp.ne.s32.totalorder %s42_s28, %s1897_s16  ;;  %p1903_p5 = scmp.lt.s32.totalorder %s1897_s16, %s1897_s16 }
  0x10   :  { %p1904_p6 = por %p1903_p5, %p1902_p4 }
  0x12   :  { %p1905_p7 = pnand %p1904_p6, %p1898_p3 }
  0x14   :  { %1908 = shalt.err (!%p1905_p7)
}
  0x15   :  { %s2077_s17 = smov 64   ;;  %s2078_s18 = smov 4  }
  0x16   :  { %47 = dma.hbm_to_vmem [thread:$0]  %s2568_s1, 128, %s42_s28, [#allocation10], %s2077_s17, %s2077_s17, %s2078_s18  }
  0x17   :  { %s1909_s23 = scalar_lea.hbm %s2567_s0, 128 }
  0x18   :  { %p1910_p8 = scmp.ne.s32.totalorder %s2567_s0, %s1909_s23  ;;  %p1913_p9 = scmp.lt.u32.totalorder %s1909_s23, %s2567_s0 }
  0x1a   :  { %p1915_p10 = pnand %p1913_p9, %p1910_p8 }
  0x1c   :  { %1918 = shalt.err (!%p1915_p10)
}
  0x1d   :  { %s1919_s29 = scalar_lea.vmem %s2140_s30, 128  ;;  %p1924_p12 = scmp.lt.s32.totalorder %s2140_s30, %s2140_s30 }
  0x1e   :  { %p1920_p11 = scmp.ne.s32.totalorder %s2140_s30, %s1919_s29  ;;  %p1925_p13 = scmp.lt.s32.totalorder %s1919_s29, %s1919_s29 }
  0x20   :  { %p1926_p0 = por %p1925_p13, %p1924_p12 }
  0x22   :  { %p1927_p1 = pnand %p1926_p0, %p1920_p11 }
  0x24   :  { %1930 = shalt.err (!%p1927_p1)
}
  0x25   :  { %31 = dma.hbm_to_vmem [thread:$0]  %s2567_s0, 128, %s2140_s30, [#allocation7], %s2077_s17, %s2077_s17, %s2078_s18  }
  0x26   :  { %s2079_s9 = smov [#allocation11]   ;;  %s2080_s11 = smov [#allocation12]  }
  0x27   :  { %s53_s10 = sshll.u32 %s2079_s9, 4  ;;  %s65_s12 = sshll.u32 %s2080_s11, 4  ;;  %s54_s10 = int_to_ptr.vmem [resolvable:$true] %s53_s10  ;;  %s2177_s12 = int_to_ptr.vmem [resolvable:$true] %s65_s12 }
  0x28   :  { %s1931_s15 = scalar_lea.hbm %s2569_s2, 256 }
  0x29   :  { %p1932_p2 = scmp.ne.s32.totalorder %s2569_s2, %s1931_s15  ;;  %p1935_p3 = scmp.lt.u32.totalorder %s1931_s15, %s2569_s2 }
  0x2b   :  { %p1937_p4 = pnand %p1935_p3, %p1932_p2 }
  0x2d   :  { %1940 = shalt.err (!%p1937_p4)
}
  0x2e   :  { %s1941_s0 = scalar_lea.vmem %s54_s10, 256  ;;  %p1946_p6 = scmp.lt.s32.totalorder %s54_s10, %s54_s10 }
  0x2f   :  { %p1942_p5 = scmp.ne.s32.totalorder %s54_s10, %s1941_s0  ;;  %p1947_p7 = scmp.lt.s32.totalorder %s1941_s0, %s1941_s0 }
  0x31   :  { %p1948_p8 = por %p1947_p7, %p1946_p6 }
  0x33   :  { %p1949_p9 = pnand %p1948_p8, %p1942_p5 }
  0x35   :  { %1952 = shalt.err (!%p1949_p9)
}
  0x36   :  { %59 = dma.hbm_to_vmem [thread:$0]  %s2569_s2, 256, %s54_s10, [#allocation10], %s2077_s17, %s2077_s17, %s2078_s18  }
  0x37   :  { %s1953_s25 = scalar_lea.hbm %s2570_s3, 256 }
  0x38   :  { %p1954_p10 = scmp.ne.s32.totalorder %s2570_s3, %s1953_s25  ;;  %p1957_p11 = scmp.lt.u32.totalorder %s1953_s25, %s2570_s3 }
  0x3a   :  { %p1959_p12 = pnand %p1957_p11, %p1954_p10 }
  0x3c   :  { %1962 = shalt.err (!%p1959_p12)
}
  0x3d   :  { %s1963_s28 = scalar_lea.vmem %s2177_s12, 256  ;;  %p1968_p0 = scmp.lt.s32.totalorder %s2177_s12, %s2177_s12 }
  0x3e   :  { %p1964_p13 = scmp.ne.s32.totalorder %s2177_s12, %s1963_s28  ;;  %p1969_p1 = scmp.lt.s32.totalorder %s1963_s28, %s1963_s28 }
  0x40   :  { %p1970_p2 = por %p1969_p1, %p1968_p0 }
  0x42   :  { %p1971_p3 = pnand %p1970_p2, %p1964_p13 }
  0x44   :  { %1974 = shalt.err (!%p1971_p3)
}
  0x45   :  { %71 = dma.hbm_to_vmem [thread:$0]  %s2570_s3, 256, %s2177_s12, [#allocation13], %s2077_s17, %s2077_s17, %s2078_s18  }
  0x46   :  { %2063 = dma.done.wait [#allocation7], 128  }
  0x47   :  { %2064 = vsyncadd [#allocation7], 4294967168 }
  0x48   :  { %2065 = dma.done.wait [#allocation10], 384  }
  0x49   :  { %2066 = vsyncadd [#allocation10], 4294966912 }
  0x4a   :  { %2067 = dma.done.wait [#allocation13], 256  }
  0x4b   :  { %2068 = vsyncadd [#allocation13], 4294967040  ;;  %vm93_vm0 = vcmask 123904   ;;  %v2081_v0 = vmov 0.0   ;;  %vm2082_vm1 = vmmov 0   ;;  %v1785_v1 = vld [vmem:[#allocation11 + $0x8] sm:$0xff]  }
  0x4c   :  { %1663 = vmatprep.subr.bf16.mxu1 %v2081_v0  ;;  %1657 = vmatprep.subr.bf16.mxu0 %v2081_v0  ;;  %95 = vst.msk [vmem:[#allocation4 + $0x2] sm:$0x3] %vm93_vm0, %v2081_v0  ;;  %94 = vst.msk [vmem:[#allocation4] sm:$0x3] %vm93_vm0, %v2081_v0  ;;  %v1786_v2 = vld [vmem:[#allocation11] sm:$0xff]   ;;  %vm118_vm2 = vcmask 130048  }
  0x4d   :  { %96 = vst.msk [vmem:[#allocation5] sm:$0x3] %vm93_vm0, %v2081_v0  ;;  %97 = vst.msk [vmem:[#allocation5 + $0x2] sm:$0x3] %vm93_vm0, %v2081_v0  ;;  %1665 = vmatprep.mubr.msk.bf16.mxu1 %vm2082_vm1, %v2081_v0  ;;  %1659 = vmatprep.mubr.msk.bf16.mxu0 %vm2082_vm1, %v2081_v0  ;;  %v1787_v3 = vld [vmem:[#allocation9] sm:$0xff]   ;;  %v1788_v4 = vld [vmem:[#allocation6] sm:$0xff]  }
  0x4e   :  { %1664 = vmatpush3.bf16.msra.mxu1 %v1785_v1  ;;  %1658 = vmatpush3.bf16.msra.mxu0 %v1786_v2  ;;  %v2229_v5 = vld [vmem:[#allocation12 + $0x8] sm:$0xff]   ;;  %v2233_v6 = vld [vmem:[#allocation12] sm:$0xff]   ;;  %s2083_s3 = smov 16   ;;  %v1599_v13 = vld [vmem:[%s2571_s4 + $0x1] ss:$0 sm:$0xff]  ;;  %vm163_vm3 = vcmask 523264  }
  0x4f   :  { %1675 = vmatprep.subr.bf16.mxu1 %v2081_v0  ;;  %1669 = vmatprep.subr.bf16.mxu0 %v2081_v0  ;;  %v1595_v14 = vld [vmem:[%s2571_s4] ss:$0 sm:$0xff]  ;;  %s2084_s4 = smov 96   ;;  %s2085_s12 = smov 32  }
  0x50   :  { %s2086_s13 = smov 80   ;;  %s2087_s14 = smov 112  }
  0x51   :  { %1666 = vmatmul.mubr.msk.bf16.vlgmr.msra.gmra.mrb[0].mxu1 %vm118_vm2, %v1787_v3  ;;  %1660 = vmatmul.mubr.msk.bf16.vlgmr.msra.gmra.mrb[0].mxu0 %vm118_vm2, %v1788_v4  ;;  %s2088_s15 = smov [#allocation14]   ;;  %s2089_s19 = smov [#allocation15]  }
  0x52   :  { %1676 = vmatpush3.bf16.msra.mxu1 %v2229_v5  ;;  %1670 = vmatpush3.bf16.msra.mxu0 %v2233_v6  ;;  %s1526_s16 = sshll.u32 %s2088_s15, 4  ;;  %s1542_s20 = sshll.u32 %s2089_s19, 4  ;;  %s1527_s16 = int_to_ptr.vmem [resolvable:$true] %s1526_s16  ;;  %s1543_s20 = int_to_ptr.vmem [resolvable:$true] %s1542_s20 }
  0x53   :  { %v241_v7 = vld [vmem:[#allocation4 + $0x2] sm:$0x3]  ;;  %1677 = vmatprep.mubr.msk.bf16.mxu1 %vm2082_vm1, %v2081_v0  ;;  %v238_v9 = vld [vmem:[#allocation4] sm:$0x3]  ;;  %1671 = vmatprep.mubr.msk.bf16.mxu0 %vm2082_vm1, %v2081_v0  ;;  %s2090_s21 = smov [#allocation17]   ;;  %s2091_s30 = smov [#allocation18]  }
  0x54   :  { %v243_v8 = vld [vmem:[#allocation5 + $0x2] sm:$0x3]  ;;  %v324_v10 = vpack.c.bf16 %v241_v7, %v241_v7  ;;  %v239_v11 = vld [vmem:[#allocation5] sm:$0x3]  ;;  %1681 = vmatprep.subr.bf16.mxu0 %v2081_v0  ;;  %1687 = vmatprep.subr.bf16.mxu1 %v2081_v0  ;;  %v247_v12 = vpack.c.bf16 %v238_v9, %v238_v9  ;;  %s1554_s0 = sshll.u32 %s2090_s21, 4  ;;  %s1566_s22 = sshll.u32 %s2091_s30, 4  ;;  %s2508_s0 = int_to_ptr.vmem [resolvable:$true] %s1554_s0  ;;  %s2513_s22 = int_to_ptr.vmem [resolvable:$true] %s1566_s22 }
  0x55   :  { %381 = vrot.lane.b32.xlu1 %v243_v8, %s2083_s3  ;;  %s1975_s23 = scalar_lea.vmem %s1527_s16, 256  ;;  %p1980_p5 = scmp.lt.s32.totalorder %s1527_s16, %s1527_s16 }
  0x56   :  { %p1976_p4 = scmp.ne.s32.totalorder %s1527_s16, %s1975_s23  ;;  %p1981_p6 = scmp.lt.s32.totalorder %s1975_s23, %s1975_s23 }
  0x58   :  { %p1982_p7 = por %p1981_p6, %p1980_p5 }
  0x59   :  { %304 = vrot.lane.b32.xlu1 %v239_v11, %s2083_s3  ;;  %1678 = vmatmul.mubr.msk.bf16.vlgmr.msra.gmra.mrb[4].mxu1 %vm118_vm2, %v324_v10 }
  0x5a   :  { %1672 = vmatmul.mubr.msk.bf16.vlgmr.msra.gmra.mrb[4].mxu0 %vm118_vm2, %v247_v12  ;;  %1688 = vmatpush3.bf16.msra.mxu1 %v2229_v5  ;;  %p1983_p8 = pnand %p1982_p7, %p1976_p4 }
  0x5b   :  { %1682 = vmatpush3.bf16.msra.mxu0 %v2233_v6  ;;  %1689 = vmatprep.mubr.msk.bf16.mxu1 %vm2082_vm1, %v2081_v0 }
  0x5c   :  { %1683 = vmatprep.mubr.msk.bf16.mxu0 %vm2082_vm1, %v2081_v0  ;;  %1693 = vmatprep.subr.bf16.mxu0 %v2081_v0 }
  0x5d   :  { %1699 = vmatprep.subr.bf16.mxu1 %v2081_v0 }
  0xc7   :  { %v382_v53 = vpop.permute.xlu1 %381 }
  0xcb   :  { %v305_v55 = vpop.permute.xlu1 %304 }
 0x124   :  { %v224_v15 = vpop.f32.mrb[0].mxu1  ;;  %v156_v18 = vpop.f32.mrb[0].mxu0 }
 0x125   :  { %v225_v16 = vadd.f32 %v1599_v13, %v224_v15  ;;  %v1667_v17 = vpop.f32.mrb[1].mxu1  ;;  %v157_v20 = vadd.f32 %v1595_v14, %v156_v18  ;;  %v1661_v21 = vpop.f32.mrb[1].mxu0 }
 0x126   :  { %v227_v19 = vpop.f32.mrb[2].mxu1  ;;  %v159_v24 = vpop.f32.mrb[2].mxu0 }
 0x127   :  { %231 = vst.msk [vmem:[#allocation3] sm:$0xff] %vm163_vm3, %v225_v16  ;;  %v228_v22 = vadd.f32 %v1599_v13, %v227_v19  ;;  %v1668_v23 = vpop.f32.mrb[3].mxu1  ;;  %164 = vst.msk [vmem:[#allocation2] sm:$0xff] %vm163_vm3, %v157_v20  ;;  %v160_v25 = vadd.f32 %v1595_v14, %v159_v24  ;;  %v1662_v26 = vpop.f32.mrb[3].mxu0 }
 0x129   :  { %232 = vst.msk [vmem:[#allocation3 + $0x8] sm:$0xff] %vm163_vm3, %v228_v22  ;;  %165 = vst.msk [vmem:[#allocation2 + $0x8] sm:$0xff] %vm163_vm3, %v160_v25 }
 0x12c   :  { %v368_v27 = vpop.f32.mrb[4].mxu1 }
 0x12d   :  { %v1679_v28 = vpop.f32.mrb[5].mxu1  ;;  %v291_v29 = vpop.f32.mrb[4].mxu0 }
 0x12e   :  { %v371_v30 = vpop.f32.mrb[6].mxu1  ;;  %v1673_v31 = vpop.f32.mrb[5].mxu0  ;;  %v244_v33 = vld [vmem:[#allocation2] sm:$0x3]  ;;  %v414_v16 = vld [vmem:[#allocation2 + $0x2] sm:$0x3] }
 0x12f   :  { %v1680_v32 = vpop.f32.mrb[7].mxu1  ;;  %v294_v34 = vpop.f32.mrb[6].mxu0  ;;  %v297_v38 = vadd.f32 %v291_v29, %v244_v33 }
 0x130   :  { %v246_v35 = vld [vmem:[#allocation3 + $0xe] sm:$0x3]  ;;  %v1674_v36 = vpop.f32.mrb[7].mxu0  ;;  %v416_v10 = vld [vmem:[#allocation3 + $0xc] sm:$0x3] }
 0x131   :  { %v374_v37 = vadd.f32 %v368_v27, %v246_v35  ;;  %v298_v42 = vmul.f32 0.5, %v297_v38 }
 0x133   :  { %1791 = vtanh.f32 %v374_v37  ;;  %v375_v41 = vmul.f32 0.5, %v374_v37 }
 0x134   :  { %1793 = vtanh.f32 %v297_v38 }
 0x135   :  { %1795 = vtanh.f32 %v375_v41 }
 0x136   :  { %1797 = vtanh.f32 %v298_v42 }
 0x13d   :  { %v1792_v39 = vpop.eup %1791 }
 0x13e   :  { %386 = vrot.lane.b32.xlu0 %v1792_v39, %s2084_s4  ;;  %v1794_v40 = vpop.eup %1793 }
 0x13f   :  { %v1796_v43 = vpop.eup %1795 }
 0x140   :  { %v377_v44 = vadd.f32 1.0, %v1796_v43  ;;  %v1798_v45 = vpop.eup %1797 }
 0x141   :  { %v300_v47 = vadd.f32 1.0, %v1798_v45 }
 0x142   :  { %309 = vrot.lane.b32.xlu0 %v1794_v40, %s2084_s4  ;;  %v378_v46 = vmul.f32 0.5, %v377_v44 }
 0x143   :  { %v301_v50 = vmul.f32 0.5, %v300_v47 }
 0x144   :  { %v384_v54 = vmul.f32 %v382_v53, %v378_v46 }
 0x145   :  { %v307_v58 = vmul.f32 %v305_v55, %v301_v50 }
 0x1b0   :  { %v387_v48 = vpop.permute.xlu0 %386 }
 0x1b1   :  { %v389_v49 = vmul.f32 %v387_v48, %v378_v46 }
 0x1b3   :  { %391 = vrot.lane.b32.xlu0 %v389_v49, %s2083_s3 }
 0x1b4   :  { %v310_v51 = vpop.permute.xlu0 %309 }
 0x1b5   :  { %v312_v52 = vmul.f32 %v310_v51, %v301_v50 }
 0x1b7   :  { %314 = vrot.lane.b32.xlu1 %v312_v52, %s2083_s3  ;;  %v572_v52 = vld [vmem:[#allocation3 + $0xa] sm:$0x3] }
 0x225   :  { %v392_v56 = vpop.permute.xlu0 %391 }
 0x226   :  { %v2270_v57 = vadd.f32 %v392_v56, %v384_v54 }
 0x228   :  { %1799 = vtanh.f32 %v2270_v57 }
 0x229   :  { %v315_v59 = vpop.permute.xlu1 %314 }
 0x22a   :  { %v2273_v60 = vadd.f32 %v315_v59, %v307_v58  ;;  %v570_v58 = vld [vmem:[#allocation2 + $0x4] sm:$0x3] }
 0x22c   :  { %1801 = vtanh.f32 %v2273_v60 }
 0x232   :  { %v1800_v61 = vpop.eup %1799 }
 0x233   :  { %397 = vrot.lane.b32.xlu0 %v1800_v61, %s2085_s12 }
 0x236   :  { %v1802_v62 = vpop.eup %1801 }
 0x237   :  { %320 = vrot.lane.b32.xlu1 %v1802_v62, %s2085_s12 }
 0x2a5   :  { %v398_v63 = vpop.permute.xlu0 %397 }
 0x2a6   :  { %v2278_v1 = vmul.f32 %v398_v63, %v378_v46 }
 0x2a8   :  { %v487_v2 = vpack.c.bf16 %v2278_v1, %v2278_v1 }
 0x2a9   :  { %v321_v3 = vpop.permute.xlu1 %320 }
 0x2aa   :  { %v2282_v4 = vmul.f32 %v321_v3, %v301_v50  ;;  %489 = vrot.lane.b32.xlu0 %v487_v2, %s2086_s13 }
 0x2ac   :  { %v417_v7 = vpack.c.bf16 %v2282_v4, %v2282_v4 }
 0x2ae   :  { %419 = vrot.lane.b32.xlu1 %v417_v7, %s2086_s13 }
 0x31c   :  { %v490_v8 = vpop.permute.xlu0 %489 }
 0x31d   :  { %1690 = vmatmul.mubr.msk.bf16.vlgmr.msra.gmra.mrb[8].mxu1 %vm118_vm2, %v490_v8 }
 0x31e   :  { %1700 = vmatpush3.bf16.msra.mxu1 %v2229_v5  ;;  %1701 = vmatprep.mubr.msk.bf16.mxu1 %vm2082_vm1, %v2081_v0 }
 0x31f   :  { %1711 = vmatprep.subr.bf16.mxu1 %v2081_v0 }
 0x320   :  { %v420_v9 = vpop.permute.xlu1 %419 }
 0x321   :  { %1684 = vmatmul.mubr.msk.bf16.vlgmr.msra.gmra.mrb[8].mxu0 %vm118_vm2, %v420_v9 }
 0x322   :  { %1694 = vmatpush3.bf16.msra.mxu0 %v2233_v6  ;;  %1695 = vmatprep.mubr.msk.bf16.mxu0 %vm2082_vm1, %v2081_v0 }
 0x323   :  { %1705 = vmatprep.subr.bf16.mxu0 %v2081_v0 }
 0x3f0   :  { %v528_v11 = vpop.f32.mrb[8].mxu1 }
 0x3f1   :  { %v534_v12 = vadd.f32 %v528_v11, %v416_v10  ;;  %v1691_v13 = vpop.f32.mrb[9].mxu1 }
 0x3f2   :  { %v531_v14 = vpop.f32.mrb[10].mxu1 }
 0x3f3   :  { %1803 = vtanh.f32 %v534_v12  ;;  %v1692_v15 = vpop.f32.mrb[11].mxu1  ;;  %v535_v24 = vmul.f32 0.5, %v534_v12 }
 0x3f4   :  { %v458_v17 = vpop.f32.mrb[8].mxu0 }
 0x3f5   :  { %v464_v18 = vadd.f32 %v458_v17, %v414_v16  ;;  %v1685_v19 = vpop.f32.mrb[9].mxu0 }
 0x3f6   :  { %v461_v20 = vpop.f32.mrb[10].mxu0 }
 0x3f7   :  { %1805 = vtanh.f32 %v464_v18  ;;  %v1686_v21 = vpop.f32.mrb[11].mxu0  ;;  %v465_v25 = vmul.f32 0.5, %v464_v18 }
 0x3f8   :  { %1807 = vtanh.f32 %v535_v24 }
 0x3f9   :  { %1809 = vtanh.f32 %v465_v25 }
 0x3fd   :  { %v1804_v22 = vpop.eup %1803 }
 0x3fe   :  { %542 = vrot.lane.b32.xlu0 %v1804_v22, %s2084_s4 }
 0x401   :  { %v1806_v23 = vpop.eup %1805 }
 0x402   :  { %472 = vrot.lane.b32.xlu1 %v1806_v23, %s2084_s4  ;;  %v1808_v26 = vpop.eup %1807 }
 0x403   :  { %v537_v27 = vadd.f32 1.0, %v1808_v26  ;;  %v1810_v28 = vpop.eup %1809 }
 0x404   :  { %v467_v30 = vadd.f32 1.0, %v1810_v28 }
 0x405   :  { %v538_v29 = vmul.f32 0.5, %v537_v27 }
 0x406   :  { %v468_v33 = vmul.f32 0.5, %v467_v30 }
 0x407   :  { %v540_v36 = vmul.f32 %v538_v29, %v2270_v57 }
 0x408   :  { %v470_v39 = vmul.f32 %v468_v33, %v2273_v60 }
 0x470   :  { %v543_v31 = vpop.permute.xlu0 %542 }
 0x471   :  { %v545_v32 = vmul.f32 %v543_v31, %v538_v29 }
 0x473   :  { %547 = vrot.lane.b32.xlu0 %v545_v32, %s2083_s3 }
 0x474   :  { %v473_v34 = vpop.permute.xlu1 %472 }
 0x475   :  { %v475_v35 = vmul.f32 %v473_v34, %v468_v33 }
 0x477   :  { %477 = vrot.lane.b32.xlu1 %v475_v35, %s2083_s3  ;;  %v728_v35 = vld [vmem:[#allocation3 + $0x8] sm:$0x3] }
 0x4e5   :  { %v548_v37 = vpop.permute.xlu0 %547 }
 0x4e6   :  { %v550_v38 = vadd.f32 %v548_v37, %v540_v36 }
 0x4e8   :  { %1811 = vtanh.f32 %v550_v38 }
 0x4e9   :  { %v478_v40 = vpop.permute.xlu1 %477 }
 0x4ea   :  { %v480_v41 = vadd.f32 %v478_v40, %v470_v39 }
 0x4ec   :  { %1813 = vtanh.f32 %v480_v41 }
 0x4f2   :  { %v1812_v42 = vpop.eup %1811 }
 0x4f3   :  { %553 = vrot.lane.b32.xlu0 %v1812_v42, %s2085_s12 }
 0x4f6   :  { %v1814_v43 = vpop.eup %1813 }
 0x4f7   :  { %483 = vrot.lane.b32.xlu1 %v1814_v43, %s2085_s12 }
 0x565   :  { %v554_v44 = vpop.permute.xlu0 %553 }
 0x566   :  { %v2306_v45 = vmul.f32 %v554_v44, %v538_v29 }
 0x568   :  { %v643_v46 = vpack.c.bf16 %v2306_v45, %v2306_v45 }
 0x569   :  { %v484_v47 = vpop.permute.xlu1 %483 }
 0x56a   :  { %v2310_v48 = vmul.f32 %v484_v47, %v468_v33  ;;  %645 = vrot.lane.b32.xlu0 %v643_v46, %s2086_s13 }
 0x56c   :  { %v573_v49 = vpack.c.bf16 %v2310_v48, %v2310_v48 }
 0x56e   :  { %575 = vrot.lane.b32.xlu1 %v573_v49, %s2086_s13 }
 0x5dc   :  { %v646_v50 = vpop.permute.xlu0 %645 }
 0x5dd   :  { %1702 = vmatmul.mubr.msk.bf16.vlgmr.msra.gmra.mrb[12].mxu1 %vm118_vm2, %v646_v50 }
 0x5de   :  { %1712 = vmatpush3.bf16.msra.mxu1 %v2229_v5  ;;  %1713 = vmatprep.mubr.msk.bf16.mxu1 %vm2082_vm1, %v2081_v0 }
 0x5df   :  { %1723 = vmatprep.subr.bf16.mxu1 %v2081_v0 }
 0x5e0   :  { %v576_v51 = vpop.permute.xlu1 %575 }
 0x5e1   :  { %1696 = vmatmul.mubr.msk.bf16.vlgmr.msra.gmra.mrb[12].mxu0 %vm118_vm2, %v576_v51 }
 0x5e2   :  { %1706 = vmatpush3.bf16.msra.mxu0 %v2233_v6  ;;  %1707 = vmatprep.mubr.msk.bf16.mxu0 %vm2082_vm1, %v2081_v0 }
 0x5e3   :  { %1717 = vmatprep.subr.bf16.mxu0 %v2081_v0 }
 0x6b0   :  { %v684_v53 = vpop.f32.mrb[12].mxu1 }
 0x6b1   :  { %v690_v54 = vadd.f32 %v684_v53, %v572_v52  ;;  %v1703_v55 = vpop.f32.mrb[13].mxu1 }
 0x6b2   :  { %v687_v56 = vpop.f32.mrb[14].mxu1 }
 0x6b3   :  { %1815 = vtanh.f32 %v690_v54  ;;  %v1704_v57 = vpop.f32.mrb[15].mxu1  ;;  %v691_v7 = vmul.f32 0.5, %v690_v54 }
 0x6b4   :  { %v614_v59 = vpop.f32.mrb[12].mxu0 }
 0x6b5   :  { %v620_v60 = vadd.f32 %v614_v59, %v570_v58  ;;  %v1697_v61 = vpop.f32.mrb[13].mxu0 }
 0x6b6   :  { %v617_v62 = vpop.f32.mrb[14].mxu0 }
 0x6b7   :  { %1817 = vtanh.f32 %v620_v60  ;;  %v1698_v63 = vpop.f32.mrb[15].mxu0  ;;  %v621_v8 = vmul.f32 0.5, %v620_v60 }
 0x6b8   :  { %1819 = vtanh.f32 %v691_v7 }
 0x6b9   :  { %1821 = vtanh.f32 %v621_v8 }
 0x6bd   :  { %v1816_v2 = vpop.eup %1815 }
 0x6be   :  { %698 = vrot.lane.b32.xlu0 %v1816_v2, %s2084_s4 }
 0x6c1   :  { %v1818_v3 = vpop.eup %1817 }
 0x6c2   :  { %628 = vrot.lane.b32.xlu1 %v1818_v3, %s2084_s4  ;;  %v1820_v9 = vpop.eup %1819 }
 0x6c3   :  { %v693_v10 = vadd.f32 1.0, %v1820_v9  ;;  %v1822_v11 = vpop.eup %1821 }
 0x6c4   :  { %v623_v13 = vadd.f32 1.0, %v1822_v11 }
 0x6c5   :  { %v694_v12 = vmul.f32 0.5, %v693_v10 }
 0x6c6   :  { %v624_v16 = vmul.f32 0.5, %v623_v13 }
 0x6c7   :  { %v696_v19 = vmul.f32 %v694_v12, %v550_v38 }
 0x6c8   :  { %v626_v22 = vmul.f32 %v624_v16, %v480_v41  ;;  %v726_v41 = vld [vmem:[#allocation2 + $0x6] sm:$0x3] }
 0x730   :  { %v699_v14 = vpop.permute.xlu0 %698 }
 0x731   :  { %v701_v15 = vmul.f32 %v699_v14, %v694_v12 }
 0x733   :  { %703 = vrot.lane.b32.xlu0 %v701_v15, %s2083_s3 }
 0x734   :  { %v629_v17 = vpop.permute.xlu1 %628 }
 0x735   :  { %v631_v18 = vmul.f32 %v629_v17, %v624_v16 }
 0x737   :  { %633 = vrot.lane.b32.xlu1 %v631_v18, %s2083_s3 }
 0x7a5   :  { %v704_v20 = vpop.permute.xlu0 %703 }
 0x7a6   :  { %v706_v21 = vadd.f32 %v704_v20, %v696_v19  ;;  %v884_v20 = vld [vmem:[#allocation3 + $0x6] sm:$0x3] }
 0x7a8   :  { %1823 = vtanh.f32 %v706_v21 }
 0x7a9   :  { %v634_v23 = vpop.permute.xlu1 %633 }
 0x7aa   :  { %v636_v24 = vadd.f32 %v634_v23, %v626_v22 }
 0x7ac   :  { %1825 = vtanh.f32 %v636_v24 }
 0x7b2   :  { %v1824_v25 = vpop.eup %1823 }
 0x7b3   :  { %709 = vrot.lane.b32.xlu0 %v1824_v25, %s2085_s12 }
 0x7b6   :  { %v1826_v26 = vpop.eup %1825 }
 0x7b7   :  { %639 = vrot.lane.b32.xlu1 %v1826_v26, %s2085_s12  ;;  %v882_v26 = vld [vmem:[#allocation2 + $0x8] sm:$0x3] }
 0x825   :  { %v710_v27 = vpop.permute.xlu0 %709 }
 0x826   :  { %v2332_v28 = vmul.f32 %v710_v27, %v694_v12 }
 0x828   :  { %v799_v29 = vpack.c.bf16 %v2332_v28, %v2332_v28 }
 0x829   :  { %v640_v30 = vpop.permute.xlu1 %639 }
 0x82a   :  { %v2336_v31 = vmul.f32 %v640_v30, %v624_v16  ;;  %801 = vrot.lane.b32.xlu0 %v799_v29, %s2086_s13 }
 0x82c   :  { %v729_v32 = vpack.c.bf16 %v2336_v31, %v2336_v31 }
 0x82e   :  { %731 = vrot.lane.b32.xlu1 %v729_v32, %s2086_s13 }
 0x89c   :  { %v802_v33 = vpop.permute.xlu0 %801 }
 0x89d   :  { %1714 = vmatmul.mubr.msk.bf16.vlgmr.msra.gmra.mrb[16].mxu1 %vm118_vm2, %v802_v33 }
 0x89e   :  { %1724 = vmatpush3.bf16.msra.mxu1 %v2229_v5  ;;  %1725 = vmatprep.mubr.msk.bf16.mxu1 %vm2082_vm1, %v2081_v0 }
 0x89f   :  { %1735 = vmatprep.subr.bf16.mxu1 %v2081_v0 }
 0x8a0   :  { %v732_v34 = vpop.permute.xlu1 %731 }
 0x8a1   :  { %1708 = vmatmul.mubr.msk.bf16.vlgmr.msra.gmra.mrb[16].mxu0 %vm118_vm2, %v732_v34 }
 0x8a2   :  { %1718 = vmatpush3.bf16.msra.mxu0 %v2233_v6  ;;  %1719 = vmatprep.mubr.msk.bf16.mxu0 %vm2082_vm1, %v2081_v0 }
 0x8a3   :  { %1729 = vmatprep.subr.bf16.mxu0 %v2081_v0 }
 0x970   :  { %v840_v36 = vpop.f32.mrb[16].mxu1 }
 0x971   :  { %v846_v37 = vadd.f32 %v840_v36, %v728_v35  ;;  %v1715_v38 = vpop.f32.mrb[17].mxu1 }
 0x972   :  { %v843_v39 = vpop.f32.mrb[18].mxu1 }
 0x973   :  { %1827 = vtanh.f32 %v846_v37  ;;  %v1716_v40 = vpop.f32.mrb[19].mxu1  ;;  %v847_v51 = vmul.f32 0.5, %v846_v37 }
 0x974   :  { %v770_v42 = vpop.f32.mrb[16].mxu0 }
 0x975   :  { %v776_v43 = vadd.f32 %v770_v42, %v726_v41  ;;  %v1709_v44 = vpop.f32.mrb[17].mxu0 }
 0x976   :  { %v773_v46 = vpop.f32.mrb[18].mxu0 }
 0x977   :  { %1829 = vtanh.f32 %v776_v43  ;;  %v1710_v47 = vpop.f32.mrb[19].mxu0  ;;  %v777_v52 = vmul.f32 0.5, %v776_v43 }
 0x978   :  { %1831 = vtanh.f32 %v847_v51 }
 0x979   :  { %1833 = vtanh.f32 %v777_v52 }
 0x97d   :  { %v1828_v49 = vpop.eup %1827 }
 0x97e   :  { %854 = vrot.lane.b32.xlu0 %v1828_v49, %s2084_s4 }
 0x981   :  { %v1830_v50 = vpop.eup %1829 }
 0x982   :  { %784 = vrot.lane.b32.xlu1 %v1830_v50, %s2084_s4  ;;  %v1832_v53 = vpop.eup %1831 }
 0x983   :  { %v849_v54 = vadd.f32 1.0, %v1832_v53  ;;  %v1834_v55 = vpop.eup %1833 }
 0x984   :  { %v779_v57 = vadd.f32 1.0, %v1834_v55 }
 0x985   :  { %v850_v56 = vmul.f32 0.5, %v849_v54 }
 0x986   :  { %v780_v60 = vmul.f32 0.5, %v779_v57 }
 0x987   :  { %v852_v63 = vmul.f32 %v850_v56, %v706_v21 }
 0x988   :  { %v782_v7 = vmul.f32 %v780_v60, %v636_v24 }
 0x9f0   :  { %v855_v58 = vpop.permute.xlu0 %854 }
 0x9f1   :  { %v857_v59 = vmul.f32 %v855_v58, %v850_v56 }
 0x9f3   :  { %859 = vrot.lane.b32.xlu0 %v857_v59, %s2083_s3 }
 0x9f4   :  { %v785_v61 = vpop.permute.xlu1 %784 }
 0x9f5   :  { %v787_v62 = vmul.f32 %v785_v61, %v780_v60 }
 0x9f7   :  { %789 = vrot.lane.b32.xlu1 %v787_v62, %s2083_s3 }
 0xa65   :  { %v860_v2 = vpop.permute.xlu0 %859 }
 0xa66   :  { %v862_v3 = vadd.f32 %v860_v2, %v852_v63 }
 0xa68   :  { %1835 = vtanh.f32 %v862_v3 }
 0xa69   :  { %v790_v8 = vpop.permute.xlu1 %789 }
 0xa6a   :  { %v792_v9 = vadd.f32 %v790_v8, %v782_v7  ;;  %v1040_v7 = vld [vmem:[#allocation3 + $0x4] sm:$0x3] }
 0xa6c   :  { %1837 = vtanh.f32 %v792_v9 }
 0xa72   :  { %v1836_v10 = vpop.eup %1835 }
 0xa73   :  { %865 = vrot.lane.b32.xlu0 %v1836_v10, %s2085_s12 }
 0xa76   :  { %v1838_v11 = vpop.eup %1837 }
 0xa77   :  { %795 = vrot.lane.b32.xlu1 %v1838_v11, %s2085_s12 }
 0xae5   :  { %v866_v12 = vpop.permute.xlu0 %865 }
 0xae6   :  { %v2358_v13 = vmul.f32 %v866_v12, %v850_v56 }
 0xae8   :  { %v955_v14 = vpack.c.bf16 %v2358_v13, %v2358_v13 }
 0xae9   :  { %v796_v15 = vpop.permute.xlu1 %795 }
 0xaea   :  { %v2362_v16 = vmul.f32 %v796_v15, %v780_v60  ;;  %957 = vrot.lane.b32.xlu0 %v955_v14, %s2086_s13  ;;  %v1038_v14 = vld [vmem:[#allocation2 + $0xa] sm:$0x3] }
 0xaec   :  { %v885_v17 = vpack.c.bf16 %v2362_v16, %v2362_v16 }
 0xaee   :  { %887 = vrot.lane.b32.xlu1 %v885_v17, %s2086_s13 }
 0xb5c   :  { %v958_v18 = vpop.permute.xlu0 %957 }
 0xb5d   :  { %1726 = vmatmul.mubr.msk.bf16.vlgmr.msra.gmra.mrb[20].mxu1 %vm118_vm2, %v958_v18 }
 0xb5e   :  { %1736 = vmatpush3.bf16.msra.mxu1 %v2229_v5  ;;  %1737 = vmatprep.mubr.msk.bf16.mxu1 %vm2082_vm1, %v2081_v0 }
 0xb5f   :  { %1747 = vmatprep.subr.bf16.mxu1 %v2081_v0 }
 0xb60   :  { %v888_v19 = vpop.permute.xlu1 %887 }
 0xb61   :  { %1720 = vmatmul.mubr.msk.bf16.vlgmr.msra.gmra.mrb[20].mxu0 %vm118_vm2, %v888_v19 }
 0xb62   :  { %1730 = vmatpush3.bf16.msra.mxu0 %v2233_v6  ;;  %1731 = vmatprep.mubr.msk.bf16.mxu0 %vm2082_vm1, %v2081_v0 }
 0xb63   :  { %1741 = vmatprep.subr.bf16.mxu0 %v2081_v0 }
 0xc30   :  { %v996_v21 = vpop.f32.mrb[20].mxu1 }
 0xc31   :  { %v1002_v22 = vadd.f32 %v996_v21, %v884_v20  ;;  %v1727_v23 = vpop.f32.mrb[21].mxu1 }
 0xc32   :  { %v999_v24 = vpop.f32.mrb[22].mxu1 }
 0xc33   :  { %1839 = vtanh.f32 %v1002_v22  ;;  %v1728_v25 = vpop.f32.mrb[23].mxu1  ;;  %v1003_v36 = vmul.f32 0.5, %v1002_v22 }
 0xc34   :  { %v926_v27 = vpop.f32.mrb[20].mxu0 }
 0xc35   :  { %v932_v29 = vadd.f32 %v926_v27, %v882_v26  ;;  %v1721_v30 = vpop.f32.mrb[21].mxu0 }
 0xc36   :  { %v929_v32 = vpop.f32.mrb[22].mxu0 }
 0xc37   :  { %1841 = vtanh.f32 %v932_v29  ;;  %v1722_v33 = vpop.f32.mrb[23].mxu0  ;;  %v933_v37 = vmul.f32 0.5, %v932_v29 }
 0xc38   :  { %1843 = vtanh.f32 %v1003_v36 }
 0xc39   :  { %1845 = vtanh.f32 %v933_v37 }
 0xc3d   :  { %v1840_v34 = vpop.eup %1839 }
 0xc3e   :  { %1010 = vrot.lane.b32.xlu0 %v1840_v34, %s2084_s4 }
 0xc41   :  { %v1842_v35 = vpop.eup %1841 }
 0xc42   :  { %940 = vrot.lane.b32.xlu1 %v1842_v35, %s2084_s4  ;;  %v1844_v38 = vpop.eup %1843 }
 0xc43   :  { %v1005_v39 = vadd.f32 1.0, %v1844_v38  ;;  %v1846_v40 = vpop.eup %1845 }
 0xc44   :  { %v935_v42 = vadd.f32 1.0, %v1846_v40 }
 0xc45   :  { %v1006_v41 = vmul.f32 0.5, %v1005_v39 }
 0xc46   :  { %v936_v46 = vmul.f32 0.5, %v935_v42 }
 0xc47   :  { %v1008_v50 = vmul.f32 %v1006_v41, %v862_v3 }
 0xc48   :  { %v938_v53 = vmul.f32 %v936_v46, %v792_v9 }
 0xcb0   :  { %v1011_v43 = vpop.permute.xlu0 %1010 }
 0xcb1   :  { %v1013_v44 = vmul.f32 %v1011_v43, %v1006_v41 }
 0xcb3   :  { %1015 = vrot.lane.b32.xlu0 %v1013_v44, %s2083_s3 }
 0xcb4   :  { %v941_v47 = vpop.permute.xlu1 %940 }
 0xcb5   :  { %v943_v49 = vmul.f32 %v941_v47, %v936_v46 }
 0xcb7   :  { %945 = vrot.lane.b32.xlu1 %v943_v49, %s2083_s3 }
 0xd25   :  { %v1016_v51 = vpop.permute.xlu0 %1015 }
 0xd26   :  { %v1018_v52 = vadd.f32 %v1016_v51, %v1008_v50 }
 0xd28   :  { %1847 = vtanh.f32 %v1018_v52 }
 0xd29   :  { %v946_v54 = vpop.permute.xlu1 %945 }
 0xd2a   :  { %v948_v55 = vadd.f32 %v946_v54, %v938_v53 }
 0xd2c   :  { %1849 = vtanh.f32 %v948_v55 }
 0xd32   :  { %v1848_v56 = vpop.eup %1847 }
 0xd33   :  { %1021 = vrot.lane.b32.xlu0 %v1848_v56, %s2085_s12 }
 0xd36   :  { %v1850_v57 = vpop.eup %1849 }
 0xd37   :  { %951 = vrot.lane.b32.xlu1 %v1850_v57, %s2085_s12 }
 0xda5   :  { %v1022_v58 = vpop.permute.xlu0 %1021 }
 0xda6   :  { %v2384_v59 = vmul.f32 %v1022_v58, %v1006_v41 }
 0xda8   :  { %v1111_v60 = vpack.c.bf16 %v2384_v59, %v2384_v59 }
 0xda9   :  { %v952_v61 = vpop.permute.xlu1 %951 }
 0xdaa   :  { %v2388_v62 = vmul.f32 %v952_v61, %v936_v46  ;;  %1113 = vrot.lane.b32.xlu0 %v1111_v60, %s2086_s13 }
 0xdac   :  { %v1041_v63 = vpack.c.bf16 %v2388_v62, %v2388_v62 }
 0xdae   :  { %1043 = vrot.lane.b32.xlu1 %v1041_v63, %s2086_s13  ;;  %v1194_v63 = vld [vmem:[#allocation2 + $0xc] sm:$0x3] }
 0xe1c   :  { %v1114_v2 = vpop.permute.xlu0 %1113 }
 0xe1d   :  { %1738 = vmatmul.mubr.msk.bf16.vlgmr.msra.gmra.mrb[24].mxu1 %vm118_vm2, %v1114_v2 }
 0xe1e   :  { %1748 = vmatpush3.bf16.msra.mxu1 %v2229_v5  ;;  %1749 = vmatprep.mubr.msk.bf16.mxu1 %vm2082_vm1, %v2081_v0 }
 0xe1f   :  { %1759 = vmatprep.subr.bf16.mxu1 %v2081_v0 }
 0xe20   :  { %v1044_v3 = vpop.permute.xlu1 %1043 }
 0xe21   :  { %1732 = vmatmul.mubr.msk.bf16.vlgmr.msra.gmra.mrb[24].mxu0 %vm118_vm2, %v1044_v3 }
 0xe22   :  { %1742 = vmatpush3.bf16.msra.mxu0 %v2233_v6  ;;  %1743 = vmatprep.mubr.msk.bf16.mxu0 %vm2082_vm1, %v2081_v0 }
 0xe23   :  { %1753 = vmatprep.subr.bf16.mxu0 %v2081_v0 }
 0xef0   :  { %v1152_v8 = vpop.f32.mrb[24].mxu1 }
 0xef1   :  { %v1158_v9 = vadd.f32 %v1152_v8, %v1040_v7  ;;  %v1739_v10 = vpop.f32.mrb[25].mxu1 }
 0xef2   :  { %v1155_v11 = vpop.f32.mrb[26].mxu1 }
 0xef3   :  { %1851 = vtanh.f32 %v1158_v9  ;;  %v1740_v12 = vpop.f32.mrb[27].mxu1  ;;  %v1159_v23 = vmul.f32 0.5, %v1158_v9 }
 0xef4   :  { %v1082_v15 = vpop.f32.mrb[24].mxu0 }
 0xef5   :  { %v1088_v17 = vadd.f32 %v1082_v15, %v1038_v14  ;;  %v1733_v18 = vpop.f32.mrb[25].mxu0 }
 0xef6   :  { %v1085_v19 = vpop.f32.mrb[26].mxu0 }
 0xef7   :  { %1853 = vtanh.f32 %v1088_v17  ;;  %v1734_v20 = vpop.f32.mrb[27].mxu0  ;;  %v1089_v24 = vmul.f32 0.5, %v1088_v17 }
 0xef8   :  { %1855 = vtanh.f32 %v1159_v23 }
 0xef9   :  { %1857 = vtanh.f32 %v1089_v24 }
 0xefd   :  { %v1852_v21 = vpop.eup %1851 }
 0xefe   :  { %1166 = vrot.lane.b32.xlu0 %v1852_v21, %s2084_s4 }
 0xf01   :  { %v1854_v22 = vpop.eup %1853 }
 0xf02   :  { %1096 = vrot.lane.b32.xlu1 %v1854_v22, %s2084_s4  ;;  %v1856_v25 = vpop.eup %1855 }
 0xf03   :  { %v1161_v26 = vadd.f32 1.0, %v1856_v25  ;;  %v1858_v27 = vpop.eup %1857 }
 0xf04   :  { %v1091_v30 = vadd.f32 1.0, %v1858_v27 }
 0xf05   :  { %v1162_v29 = vmul.f32 0.5, %v1161_v26 }
 0xf06   :  { %v1092_v34 = vmul.f32 0.5, %v1091_v30 }
 0xf07   :  { %v1164_v37 = vmul.f32 %v1162_v29, %v1018_v52 }
 0xf08   :  { %v1094_v40 = vmul.f32 %v1092_v34, %v948_v55  ;;  %v1196_v55 = vld [vmem:[#allocation3 + $0x2] sm:$0x3] }
 0xf70   :  { %v1167_v32 = vpop.permute.xlu0 %1166 }
 0xf71   :  { %v1169_v33 = vmul.f32 %v1167_v32, %v1162_v29 }
 0xf73   :  { %1171 = vrot.lane.b32.xlu0 %v1169_v33, %s2083_s3 }
 0xf74   :  { %v1097_v35 = vpop.permute.xlu1 %1096 }
 0xf75   :  { %v1099_v36 = vmul.f32 %v1097_v35, %v1092_v34 }
 0xf77   :  { %1101 = vrot.lane.b32.xlu1 %v1099_v36, %s2083_s3 }
 0xfe5   :  { %v1172_v38 = vpop.permute.xlu0 %1171 }
 0xfe6   :  { %v1174_v39 = vadd.f32 %v1172_v38, %v1164_v37 }
 0xfe8   :  { %1859 = vtanh.f32 %v1174_v39 }
 0xfe9   :  { %v1102_v41 = vpop.permute.xlu1 %1101 }
 0xfea   :  { %v1104_v42 = vadd.f32 %v1102_v41, %v1094_v40  ;;  %v1351_v41 = vld [vmem:[#allocation3] sm:$0x3] }
 0xfec   :  { %1861 = vtanh.f32 %v1104_v42 }
 0xff2   :  { %v1860_v43 = vpop.eup %1859 }
 0xff3   :  { %1177 = vrot.lane.b32.xlu0 %v1860_v43, %s2085_s12 }
 0xff6   :  { %v1862_v44 = vpop.eup %1861 }
 0xff7   :  { %1107 = vrot.lane.b32.xlu1 %v1862_v44, %s2085_s12 }
0x1065   :  { %v1178_v46 = vpop.permute.xlu0 %1177 }
0x1066   :  { %v2410_v47 = vmul.f32 %v1178_v46, %v1162_v29 }
0x1068   :  { %v1267_v49 = vpack.c.bf16 %v2410_v47, %v2410_v47 }
0x1069   :  { %v1108_v50 = vpop.permute.xlu1 %1107 }
0x106a   :  { %v2414_v51 = vmul.f32 %v1108_v50, %v1092_v34  ;;  %1269 = vrot.lane.b32.xlu0 %v1267_v49, %s2086_s13  ;;  %v1350_v50 = vld [vmem:[#allocation2 + $0xe] sm:$0x3] }
0x106c   :  { %v1197_v52 = vpack.c.bf16 %v2414_v51, %v2414_v51 }
0x106e   :  { %1199 = vrot.lane.b32.xlu1 %v1197_v52, %s2086_s13 }
0x10dc   :  { %v1270_v53 = vpop.permute.xlu0 %1269 }
0x10dd   :  { %1750 = vmatmul.mubr.msk.bf16.vlgmr.msra.gmra.mrb[28].mxu1 %vm118_vm2, %v1270_v53 }
0x10de   :  { %1760 = vmatpush3.bf16.msra.mxu1 %v2229_v5  ;;  %1761 = vmatprep.mubr.msk.bf16.mxu1 %vm2082_vm1, %v2081_v0 }
0x10e0   :  { %v1200_v54 = vpop.permute.xlu1 %1199 }
0x10e1   :  { %1744 = vmatmul.mubr.msk.bf16.vlgmr.msra.gmra.mrb[28].mxu0 %vm118_vm2, %v1200_v54 }
0x10e2   :  { %1754 = vmatpush3.bf16.msra.mxu0 %v2233_v6  ;;  %1755 = vmatprep.mubr.msk.bf16.mxu0 %vm2082_vm1, %v2081_v0 }
0x11b0   :  { %v1308_v56 = vpop.f32.mrb[28].mxu1 }
0x11b1   :  { %v1314_v57 = vadd.f32 %v1308_v56, %v1196_v55  ;;  %v1751_v58 = vpop.f32.mrb[29].mxu1 }
0x11b2   :  { %v1311_v60 = vpop.f32.mrb[30].mxu1 }
0x11b3   :  { %1863 = vtanh.f32 %v1314_v57  ;;  %v1752_v61 = vpop.f32.mrb[31].mxu1  ;;  %v1315_v0 = vmul.f32 0.5, %v1314_v57 }
0x11b4   :  { %v1238_v5 = vpop.f32.mrb[28].mxu0 }
0x11b5   :  { %v1244_v2 = vadd.f32 %v1238_v5, %v1194_v63  ;;  %v1745_v3 = vpop.f32.mrb[29].mxu0 }
0x11b6   :  { %v1241_v7 = vpop.f32.mrb[30].mxu0 }
0x11b7   :  { %1865 = vtanh.f32 %v1244_v2  ;;  %v1746_v8 = vpop.f32.mrb[31].mxu0  ;;  %v1245_v10 = vmul.f32 0.5, %v1244_v2 }
0x11b8   :  { %1867 = vtanh.f32 %v1315_v0 }
0x11b9   :  { %1869 = vtanh.f32 %v1245_v10 }
0x11bd   :  { %v1864_v9 = vpop.eup %1863 }
0x11be   :  { %1322 = vrot.lane.b32.xlu0 %v1864_v9, %s2084_s4 }
0x11c1   :  { %v1866_v6 = vpop.eup %1865 }
0x11c2   :  { %1252 = vrot.lane.b32.xlu1 %v1866_v6, %s2084_s4  ;;  %v1868_v11 = vpop.eup %1867 }
0x11c3   :  { %v1317_v12 = vadd.f32 1.0, %v1868_v11  ;;  %v1870_v14 = vpop.eup %1869 }
0x11c4   :  { %v1247_v17 = vadd.f32 1.0, %v1870_v14 }
0x11c5   :  { %v1318_v15 = vmul.f32 0.5, %v1317_v12 }
0x11c6   :  { %v1248_v20 = vmul.f32 0.5, %v1247_v17 }
0x11c7   :  { %v1320_v23 = vmul.f32 %v1318_v15, %v1174_v39 }
0x11c8   :  { %v1250_v26 = vmul.f32 %v1248_v20, %v1104_v42 }
0x1230   :  { %v1323_v18 = vpop.permute.xlu0 %1322 }
0x1231   :  { %v1325_v19 = vmul.f32 %v1323_v18, %v1318_v15 }
0x1233   :  { %1327 = vrot.lane.b32.xlu0 %v1325_v19, %s2083_s3 }
0x1234   :  { %v1253_v21 = vpop.permute.xlu1 %1252 }
0x1235   :  { %v1255_v22 = vmul.f32 %v1253_v21, %v1248_v20 }
0x1237   :  { %1257 = vrot.lane.b32.xlu1 %v1255_v22, %s2083_s3 }
0x12a5   :  { %v1328_v24 = vpop.permute.xlu0 %1327 }
0x12a6   :  { %v1330_v25 = vadd.f32 %v1328_v24, %v1320_v23 }
0x12a8   :  { %1871 = vtanh.f32 %v1330_v25 }
0x12a9   :  { %v1258_v27 = vpop.permute.xlu1 %1257 }
0x12aa   :  { %v1260_v29 = vadd.f32 %v1258_v27, %v1250_v26 }
0x12ac   :  { %1873 = vtanh.f32 %v1260_v29 }
0x12b2   :  { %v1872_v30 = vpop.eup %1871 }
0x12b3   :  { %1333 = vrot.lane.b32.xlu0 %v1872_v30, %s2085_s12 }
0x12b6   :  { %v1874_v32 = vpop.eup %1873 }
0x12b7   :  { %1263 = vrot.lane.b32.xlu1 %v1874_v32, %s2085_s12 }
0x1325   :  { %v1334_v33 = vpop.permute.xlu0 %1333 }
0x1326   :  { %v1336_v34 = vmul.f32 %v1334_v33, %v1318_v15 }
0x1328   :  { %v1422_v35 = vpack.c.bf16 %v1336_v34, %v1336_v34 }
0x1329   :  { %v1264_v36 = vpop.permute.xlu1 %1263 }
0x132a   :  { %v2434_v37 = vmul.f32 %v1264_v36, %v1248_v20  ;;  %1424 = vrot.lane.b32.xlu0 %v1422_v35, %s2086_s13 }
0x132c   :  { %v1352_v38 = vpack.c.bf16 %v2434_v37, %v2434_v37 }
0x132e   :  { %1354 = vrot.lane.b32.xlu1 %v1352_v38, %s2086_s13 }
0x139c   :  { %v1425_v39 = vpop.permute.xlu0 %1424 }
0x139d   :  { %1762 = vmatmul.mubr.msk.bf16.vlgmr.msra.gmra.mrb[32].mxu1 %vm118_vm2, %v1425_v39 }
0x13a0   :  { %v1355_v40 = vpop.permute.xlu1 %1354 }
0x13a1   :  { %1756 = vmatmul.mubr.msk.bf16.vlgmr.msra.gmra.mrb[32].mxu0 %vm118_vm2, %v1355_v40 }
0x1470   :  { %v1463_v42 = vpop.f32.mrb[32].mxu1 }
0x1471   :  { %v1469_v43 = vadd.f32 %v1463_v42, %v1351_v41  ;;  %v1763_v44 = vpop.f32.mrb[33].mxu1 }
0x1472   :  { %v1466_v46 = vpop.f32.mrb[34].mxu1 }
0x1473   :  { %1875 = vtanh.f32 %v1469_v43  ;;  %v1764_v49 = vpop.f32.mrb[35].mxu1  ;;  %v1470_v60 = vmul.f32 0.5, %v1469_v43 }
0x1474   :  { %v1393_v52 = vpop.f32.mrb[32].mxu0 }
0x1475   :  { %v1399_v53 = vadd.f32 %v1393_v52, %v1350_v50  ;;  %v1757_v54 = vpop.f32.mrb[33].mxu0 }
0x1476   :  { %v1396_v55 = vpop.f32.mrb[34].mxu0 }
0x1477   :  { %1877 = vtanh.f32 %v1399_v53  ;;  %v1758_v56 = vpop.f32.mrb[35].mxu0  ;;  %v1400_v61 = vmul.f32 0.5, %v1399_v53 }
0x1478   :  { %1879 = vtanh.f32 %v1470_v60 }
0x1479   :  { %1881 = vtanh.f32 %v1400_v61 }
0x147d   :  { %v1876_v57 = vpop.eup %1875 }
0x147e   :  { %1477 = vrot.lane.b32.xlu0 %v1876_v57, %s2084_s4 }
0x1481   :  { %v1878_v58 = vpop.eup %1877 }
0x1482   :  { %1407 = vrot.lane.b32.xlu1 %v1878_v58, %s2084_s4  ;;  %v1880_v63 = vpop.eup %1879 }
0x1483   :  { %v1472_v5 = vadd.f32 1.0, %v1880_v63  ;;  %v1882_v2 = vpop.eup %1881 }
0x1484   :  { %v1402_v7 = vadd.f32 1.0, %v1882_v2 }
0x1485   :  { %v1473_v3 = vmul.f32 0.5, %v1472_v5 }
0x1486   :  { %v1403_v6 = vmul.f32 0.5, %v1402_v7 }
0x1487   :  { %v1475_v11 = vmul.f32 %v1473_v3, %v1330_v25 }
0x1488   :  { %v1405_v15 = vmul.f32 %v1403_v6, %v1260_v29 }
0x14f0   :  { %v1478_v8 = vpop.permute.xlu0 %1477 }
0x14f1   :  { %v1480_v9 = vmul.f32 %v1478_v8, %v1473_v3 }
0x14f3   :  { %1482 = vrot.lane.b32.xlu0 %v1480_v9, %s2083_s3 }
0x14f4   :  { %v1408_v0 = vpop.permute.xlu1 %1407 }
0x14f5   :  { %v1410_v10 = vmul.f32 %v1408_v0, %v1403_v6 }
0x14f7   :  { %1412 = vrot.lane.b32.xlu1 %v1410_v10, %s2083_s3 }
0x1565   :  { %v1483_v12 = vpop.permute.xlu0 %1482 }
0x1566   :  { %v1485_v14 = vadd.f32 %v1483_v12, %v1475_v11 }
0x1568   :  { %1883 = vtanh.f32 %v1485_v14 }
0x1569   :  { %v1413_v17 = vpop.permute.xlu1 %1412 }
0x156a   :  { %v1415_v18 = vadd.f32 %v1413_v17, %v1405_v15 }
0x156c   :  { %1885 = vtanh.f32 %v1415_v18 }
0x1572   :  { %v1884_v19 = vpop.eup %1883 }
0x1573   :  { %1488 = vrot.lane.b32.xlu0 %v1884_v19, %s2085_s12 }
0x1576   :  { %v1886_v20 = vpop.eup %1885 }
0x1577   :  { %408 = vrot.lane.b32.xlu0 %v2278_v1, %s2086_s13  ;;  %1418 = vrot.lane.b32.xlu1 %v1886_v20, %s2085_s12 }
0x157b   :  { %720 = vrot.lane.b32.xlu0 %v2332_v28, %s2086_s13  ;;  %564 = vrot.lane.b32.xlu1 %v2306_v45, %s2086_s13 }
0x157f   :  { %1032 = vrot.lane.b32.xlu0 %v2384_v59, %s2086_s13  ;;  %876 = vrot.lane.b32.xlu1 %v2358_v13, %s2086_s13 }
0x1583   :  { %1344 = vrot.lane.b32.xlu0 %v1336_v34, %s2086_s13  ;;  %1188 = vrot.lane.b32.xlu1 %v2410_v47, %s2086_s13 }
0x1587   :  { %402 = vrot.lane.b32.xlu0 %v2282_v4, %s2086_s13  ;;  %558 = vrot.lane.b32.xlu1 %v2310_v48, %s2086_s13 }
0x158b   :  { %714 = vrot.lane.b32.xlu0 %v2336_v31, %s2086_s13  ;;  %870 = vrot.lane.b32.xlu1 %v2362_v16, %s2086_s13 }
0x158f   :  { %1026 = vrot.lane.b32.xlu0 %v2388_v62, %s2086_s13  ;;  %1182 = vrot.lane.b32.xlu1 %v2414_v51, %s2086_s13 }
0x1593   :  { %1338 = vrot.lane.b32.xlu0 %v2434_v37, %s2086_s13 }
0x1597   :  { %1505 = vrot.lane.b32.xlu0 %v1415_v18, %s2087_s14 }
0x15e5   :  { %v1489_v1 = vpop.permute.xlu0 %1488 }
0x15e6   :  { %v1491_v13 = vmul.f32 %v1489_v1, %v1473_v3 }
0x15e9   :  { %v409_v4 = vpop.permute.xlu0 %408  ;;  %v1419_v45 = vpop.permute.xlu1 %1418 }
0x15ea   :  { %412 = vst.msk [vmem:[#allocation15 + $0xe] sm:$0x3] %vm93_vm0, %v409_v4  ;;  %v1421_v48 = vmul.f32 %v1419_v45, %v1403_v6 }
0x15ec   :  { %1493 = vrot.lane.b32.xlu1 %v1421_v48, %s2086_s13 }
0x15ed   :  { %v721_v28 = vpop.permute.xlu0 %720  ;;  %v565_v31 = vpop.permute.xlu1 %564 }
0x15ee   :  { %724 = vst.msk [vmem:[#allocation15 + $0xa] sm:$0x3] %vm93_vm0, %v721_v28  ;;  %568 = vst.msk [vmem:[#allocation15 + $0xc] sm:$0x3] %vm93_vm0, %v565_v31 }
0x15f0   :  { %1499 = vrot.lane.b32.xlu1 %v1491_v13, %s2086_s13 }
0x15f1   :  { %v1033_v16 = vpop.permute.xlu0 %1032  ;;  %v877_v59 = vpop.permute.xlu1 %876 }
0x15f2   :  { %1036 = vst.msk [vmem:[#allocation15 + $0x6] sm:$0x3] %vm93_vm0, %v1033_v16  ;;  %880 = vst.msk [vmem:[#allocation15 + $0x8] sm:$0x3] %vm93_vm0, %v877_v59 }
0x15f4   :  { %1511 = vrot.lane.b32.xlu1 %v1485_v14, %s2087_s14 }
0x15f5   :  { %v1345_v62 = vpop.permute.xlu0 %1344  ;;  %v1189_v47 = vpop.permute.xlu1 %1188 }
0x15f6   :  { %1348 = vst.msk [vmem:[#allocation15 + $0x2] sm:$0x3] %vm93_vm0, %v1345_v62  ;;  %1192 = vst.msk [vmem:[#allocation15 + $0x4] sm:$0x3] %vm93_vm0, %v1189_v47 }
0x15f9   :  { %v403_v51 = vpop.permute.xlu0 %402  ;;  %v559_v21 = vpop.permute.xlu1 %558 }
0x15fa   :  { %406 = vst.msk [vmem:[#allocation14] sm:$0x3] %vm93_vm0, %v403_v51  ;;  %562 = vst.msk [vmem:[#allocation14 + $0x2] sm:$0x3] %vm93_vm0, %v559_v21 }
0x15fd   :  { %v715_v22 = vpop.permute.xlu0 %714  ;;  %v871_v23 = vpop.permute.xlu1 %870 }
0x15fe   :  { %718 = vst.msk [vmem:[#allocation14 + $0x4] sm:$0x3] %vm93_vm0, %v715_v22  ;;  %874 = vst.msk [vmem:[#allocation14 + $0x6] sm:$0x3] %vm93_vm0, %v871_v23 }
0x1601   :  { %v1027_v24 = vpop.permute.xlu0 %1026  ;;  %v1183_v25 = vpop.permute.xlu1 %1182 }
0x1602   :  { %1030 = vst.msk [vmem:[#allocation14 + $0x8] sm:$0x3] %vm93_vm0, %v1027_v24  ;;  %1186 = vst.msk [vmem:[#allocation14 + $0xa] sm:$0x3] %vm93_vm0, %v1183_v25 }
0x1605   :  { %v1339_v26 = vpop.permute.xlu0 %1338 }
0x1606   :  { %1342 = vst.msk [vmem:[#allocation14 + $0xc] sm:$0x3] %vm93_vm0, %v1339_v26 }
0x1609   :  { %v1506_v27 = vpop.permute.xlu0 %1505 }
0x160a   :  { %1508 = vst.msk [vmem:[#allocation5] sm:$0x3] %vm93_vm0, %v1506_v27  ;;  %1518 = vst.msk [vmem:[#allocation18] sm:$0x3] %vm93_vm0, %v1506_v27 }
0x165e   :  { %v1494_v29 = vpop.permute.xlu1 %1493 }
0x165f   :  { %1497 = vst.msk [vmem:[#allocation14 + $0xe] sm:$0x3] %vm93_vm0, %v1494_v29  ;;  %1503 = vst.msk [vmem:[#allocation4] sm:$0x3] %vm93_vm0, %v1494_v29 }
0x1660   :  { %1515 = vst.msk [vmem:[#allocation17] sm:$0x3] %vm93_vm0, %v1494_v29 }
0x1661   :  { %1986 = shalt.err (!%p1983_p8)
}
0x1662   :  { %s1987_s26 = scalar_lea.hbm %s2572_s5, 256 }
0x1663   :  { %p1988_p9 = scmp.ne.s32.totalorder %s2572_s5, %s1987_s26  ;;  %p1991_p10 = scmp.lt.u32.totalorder %s1987_s26, %s2572_s5 }
0x1665   :  { %p1993_p11 = pnand %p1991_p10, %p1988_p9 }
0x1667   :  { %1996 = shalt.err (!%p1993_p11)
}
0x1668   :  { %s2092_s2 = smov 128   ;;  %s2093_s9 = smov 8   ;;  %v1500_v30 = vpop.permute.xlu1 %1499 }
0x1669   :  { %1532 = dma.vmem_to_hbm [thread:$0]  %s1527_s16, 256, %s2572_s5, [#allocation8], %s2092_s2, %s2092_s2, %s2093_s9   ;;  %1502 = vst.msk [vmem:[#allocation15] sm:$0x3] %vm93_vm0, %v1500_v30  ;;  %1509 = vst.msk [vmem:[#allocation4 + $0x2] sm:$0x3] %vm93_vm0, %v1500_v30 }
0x166a   :  { %1517 = vst.msk [vmem:[#allocation17 + $0x2] sm:$0x3] %vm93_vm0, %v1500_v30  ;;  %s1997_s18 = scalar_lea.vmem %s1543_s20, 256  ;;  %p2002_p13 = scmp.lt.s32.totalorder %s1543_s20, %s1543_s20 }
0x166b   :  { %p1998_p12 = scmp.ne.s32.totalorder %s1543_s20, %s1997_s18  ;;  %p2003_p0 = scmp.lt.s32.totalorder %s1997_s18, %s1997_s18 }
0x166d   :  { %p2004_p1 = por %p2003_p0, %p2002_p13 }
0x166f   :  { %p2005_p2 = pnand %p2004_p1, %p1998_p12 }
0x1671   :  { %2008 = shalt.err (!%p2005_p2)
}
0x1672   :  { %s2009_s11 = scalar_lea.hbm %s2573_s6, 256 }
0x1673   :  { %p2010_p3 = scmp.ne.s32.totalorder %s2573_s6, %s2009_s11  ;;  %p2013_p4 = scmp.lt.u32.totalorder %s2009_s11, %s2573_s6 }
0x1675   :  { %p2015_p5 = pnand %p2013_p4, %p2010_p3 }
0x1677   :  { %2018 = shalt.err (!%p2015_p5)
}
0x1678   :  { %1548 = dma.vmem_to_hbm [thread:$0]  %s1543_s20, 256, %s2573_s6, [#allocation16], %s2092_s2, %s2092_s2, %s2093_s9  }
0x1679   :  { %s2019_s21 = scalar_lea.vmem %s2508_s0, 64  ;;  %p2024_p7 = scmp.lt.s32.totalorder %s2508_s0, %s2508_s0 }
0x167a   :  { %p2020_p6 = scmp.ne.s32.totalorder %s2508_s0, %s2019_s21  ;;  %p2025_p8 = scmp.lt.s32.totalorder %s2019_s21, %s2019_s21 }
0x167c   :  { %p2026_p9 = por %p2025_p8, %p2024_p7 }
0x167e   :  { %p2027_p10 = pnand %p2026_p9, %p2020_p6 }
0x1680   :  { %2030 = shalt.err (!%p2027_p10)
}
0x1681   :  { %s2031_s24 = scalar_lea.hbm %s2574_s7, 64 }
0x1682   :  { %p2032_p11 = scmp.ne.s32.totalorder %s2574_s7, %s2031_s24  ;;  %p2035_p12 = scmp.lt.u32.totalorder %s2031_s24, %s2574_s7 }
0x1684   :  { %p2037_p13 = pnand %p2035_p12, %p2032_p11 }
0x1686   :  { %2040 = shalt.err (!%p2037_p13)
}
0x1687   :  { %s2094_s6 = smov 2   ;;  %v1512_v32 = vpop.permute.xlu1 %1511  ;;  %s2041_s28 = scalar_lea.vmem %s2513_s22, 64 }
0x1688   :  { %1560 = dma.vmem_to_hbm [thread:$0]  %s2508_s0, 64, %s2574_s7, [#allocation16], %s2085_s12, %s2085_s12, %s2094_s6   ;;  %1514 = vst.msk [vmem:[#allocation5 + $0x2] sm:$0x3] %vm93_vm0, %v1512_v32  ;;  %1520 = vst.msk [vmem:[#allocation18 + $0x2] sm:$0x3] %vm93_vm0, %v1512_v32 }
0x1689   :  { %p2042_p0 = scmp.ne.s32.totalorder %s2513_s22, %s2041_s28  ;;  %p2046_p1 = scmp.lt.s32.totalorder %s2513_s22, %s2513_s22 }
0x168a   :  { %p2047_p2 = scmp.lt.s32.totalorder %s2041_s28, %s2041_s28 }
0x168c   :  { %p2048_p3 = por %p2047_p2, %p2046_p1 }
0x168e   :  { %p2049_p4 = pnand %p2048_p3, %p2042_p0 }
0x1690   :  { %2052 = shalt.err (!%p2049_p4)
}
0x1691   :  { %s2053_s3 = scalar_lea.hbm %s2575_s8, 64 }
0x1692   :  { %p2054_p5 = scmp.ne.s32.totalorder %s2575_s8, %s2053_s3  ;;  %p2057_p6 = scmp.lt.u32.totalorder %s2053_s3, %s2575_s8 }
0x1694   :  { %p2059_p7 = pnand %p2057_p6, %p2054_p5 }
0x1696   :  { %2062 = shalt.err (!%p2059_p7)
}
0x1697   :  { %1572 = dma.vmem_to_hbm [thread:$0]  %s2513_s22, 64, %s2575_s8, [#allocation19], %s2085_s12, %s2085_s12, %s2094_s6  }
0x1698   :  { %2069 = dma.done.wait [#allocation8], 256  }
0x1699   :  { %2070 = vsyncadd [#allocation8], 4294967040 }
0x169a   :  { %2071 = dma.done.wait [#allocation16], 320  }
0x169b   :  { %2072 = vsyncadd [#allocation16], 4294966976 }
0x169c   :  { %2073 = dma.done.wait [#allocation19], 64  }
0x169d   :  { %2074 = vsyncadd [#allocation19], 4294967232 }
0x169e   :  { %1585 = vsyncpa [#allocation7], 1 }
0x169f   :  { %1586 = vsyncpa [#allocation10], 1 }
0x16a0   :  { %1587 = vsyncpa [#allocation13], 1 }
0x16a1   :  { %1588 = vsyncpa [#allocation8], 1 }
0x16a2   :  { %1589 = vsyncpa [#allocation16], 1 }
0x16a3   :  { %1590 = vsyncpa [#allocation19], 1 }

</bundles_post_ra>
